<compile_context>
chip_gen: v6e
topology: v6e:2x2x1
jax: 0.10.0
libtpu: 0.0.40
codegen_flags: <defaults>
</compile_context>

<pallas_src>
import functools
import math

import jax
import jax.numpy as jnp
from jax.experimental import pallas as pl
from jax.experimental.pallas import tpu as pltpu


def _round_up(v, m):
    return ((v + m - 1) // m) * m


def _pad2(a, rows, cols, dtype=None):
    out = jnp.pad(a, ((0, rows - a.shape[0]), (0, cols - a.shape[1])))
    return out if dtype is None else out.astype(dtype)


# --------------------------- fused forward kernel ---------------------------
def _guide_fused_kernel(
    graph_ref, x_ref, s_ref,
    gcn_w_ref, gcn_b_ref, gna_w12_ref, gna_vec_ref,
    attr_out_ref, stru_out_ref,
    *, n_gcn, n_gcn_enc, n_gna, n_gna_enc, gcn_in_dims, gcn_out_dims, fs,
):
    f32 = jnp.float32
    bf16 = jnp.bfloat16

    a = graph_ref[0]                              # bf16 [Np, Np]  normalized A_hat
    mask = graph_ref[1] > 0.0                     # bool [Np (dst), Np (src)]

    # ----- attribute path: stacked GCN layers, A_hat resident in VMEM -----
    h = x_ref[...]                                # bf16 [Np, fp_a]
    for l in range(n_gcn):
        w = gcn_w_ref[l]                          # bf16 [fp_a, fp_a]
        b = gcn_b_ref[l]                          # f32  [fp_a]
        # Pick the association from the logical widths so the N^2 matmul sees
        # the narrower feature width (moot under uniform padding, but free).
        if gcn_in_dims[l] <= gcn_out_dims[l]:
            ah = jnp.dot(a, h, preferred_element_type=f32)            # (A @ X)
            y = jnp.dot(ah.astype(bf16), w, preferred_element_type=f32) + b
        else:
            hw = jnp.dot(h, w, preferred_element_type=f32)            # (X @ W)
            y = jnp.dot(a, hw.astype(bf16), preferred_element_type=f32) + b
        last_enc = l == n_gcn_enc - 1
        last_dec = l == n_gcn - 1
        if not (last_enc or last_dec):
            y = jnp.maximum(y, 0.0)               # relu between layers only
        if last_enc:
            attr_out_ref[1] = y                   # encoder embedding (no relu)
        if last_dec:
            attr_out_ref[0] = y                   # reconstructed attributes
        h = y.astype(bf16)

    # ----- structure path: stacked GNA layers, adjacency mask resident -----
    h = s_ref[...]                                # bf16 [Np, fs]
    for l in range(n_gna):
        w12 = gna_w12_ref[l]                      # bf16 [fs, 2*fs]  == [w1 | w2]
        b12 = gna_vec_ref[2 * l]                  # f32  [2*fs]      == [b1 | b2]
        av = gna_vec_ref[2 * l + 1]               # f32  [2*fs], a in lanes [fs:fs+out)
        # single MXU pass produces both linear transforms of this layer
        h12 = jnp.dot(h, w12, preferred_element_type=f32) + b12       # [Np, 2*fs]
        # attention score via VPU broadcast-mul + lane reduction; av is zero
        # outside the w2 half, so this is exactly h2 . a with no slicing.
        score = jnp.sum(h12 * av, axis=-1, keepdims=True)             # [Np, 1]
        # logits[i, j] = tanh((h2_i - h2_j) . a) = tanh(score_i - score_j)
        logits = jnp.tanh(score - jnp.transpose(score))               # [Np, Np]
        masked = jnp.where(mask, logits, jnp.full_like(logits, -1e30))
        # row_max clamp to 0 is safe because tanh bounds logits to [-1, 1]
        row_max = jnp.maximum(jnp.max(masked, axis=1, keepdims=True), 0.0)
        e = jnp.where(mask, jnp.exp(logits - row_max), jnp.zeros_like(logits))
        denom = jnp.sum(e, axis=1, keepdims=True)
        denom = jnp.where(denom > 0.0, denom, jnp.ones_like(denom))
        alpha = e * pl.reciprocal(denom, approx=True)                 # EUP recip
        h1 = h12[:, :fs]
        h2 = h12[:, fs:]
        agg = jnp.dot(alpha.astype(bf16), h2.astype(bf16),
                      preferred_element_type=f32)
        y = jnp.maximum(h1 + agg, 0.0)            # GNA: relu after EVERY layer
        if l == n_gna_enc - 1:
            stru_out_ref[1] = y                   # structure embedding
        if l == n_gna - 1:
            stru_out_ref[0] = y                   # reconstructed structure
        h = y.astype(bf16)


# ------------------------------ parameter init ------------------------------
def _init_linear(key, fan_in, fan_out):
    kw, kb = jax.random.split(key)
    lim = 1.0 / math.sqrt(fan_in)
    w = jax.random.uniform(kw, (fan_in, fan_out), jnp.float32, -lim, lim)
    b = jax.random.uniform(kb, (1, fan_out), jnp.float32, -lim, lim)
    return w, b


def _init_gcn_stack(key, dims):
    layers = []
    for i in range(len(dims) - 1):
        key, sub = jax.random.split(key)
        layers.append(_init_linear(sub, dims[i], dims[i + 1]))
    return layers


def _init_gna_stack(key, dims):
    layers = []
    for i in range(len(dims) - 1):
        key, k1, k2, ka = jax.random.split(key, 4)
        w1, b1 = _init_linear(k1, dims[i], dims[i + 1])
        w2, b2 = _init_linear(k2, dims[i], dims[i + 1])
        av = 0.1 * jax.random.normal(ka, (dims[i + 1], 1), jnp.float32)
        layers.append((w1, b1, w2, b2, av))
    return layers


def init_guide_params(key, dim_a, dim_s, hid_a=64, hid_s=4, num_layers=4):
    enc_l = num_layers // 2
    dec_l = num_layers - enc_l
    k1, k2, k3, k4 = jax.random.split(key, 4)
    return {
        "attr_enc": _init_gcn_stack(k1, [dim_a] + [hid_a] * (enc_l - 1) + [hid_a]),
        "attr_dec": _init_gcn_stack(k2, [hid_a] + [hid_a] * (dec_l - 1) + [dim_a]),
        "stru_enc": _init_gna_stack(k3, [dim_s] + [hid_s] * (enc_l - 1) + [hid_s]),
        "stru_dec": _init_gna_stack(k4, [hid_s] + [hid_s] * (dec_l - 1) + [dim_s]),
    }


# -------------------------------- graph glue --------------------------------
def build_adj(edge_index, n):
    # adj[dst, src] = 1 (PyG semantics: directed edge list; pass both
    # directions for an undirected graph).
    src, dst = edge_index
    adj = jnp.zeros((n, n), jnp.float32)
    adj = adj.at[dst, src].set(1.0)
    return adj


def gcn_norm(adj, n):
    a_tilde = adj + jnp.eye(n, dtype=jnp.float32)
    deg = jnp.sum(a_tilde, axis=1)
    d_inv_sqrt = 1.0 / jnp.sqrt(deg)
    return a_tilde * d_inv_sqrt[:, None] * d_inv_sqrt[None, :]


# ---------------- one-time prep (hoisted out of the hot path) ----------------
def prepare_guide(params, edge_index, n):
    gcn_layers = params["attr_enc"] + params["attr_dec"]
    gna_layers = params["stru_enc"] + params["stru_dec"]
    n_gcn, n_gcn_enc = len(gcn_layers), len(params["attr_enc"])
    n_gna, n_gna_enc = len(gna_layers), len(params["stru_enc"])

    np_ = _round_up(max(n, 8), 8)                                   # sublane pad
    attr_dims = [int(d) for w, _ in gcn_layers for d in w.shape]
    fp_a = _round_up(max(attr_dims), 128)                           # attr lane pad
    stru_dims = [int(d) for l in gna_layers for d in l[0].shape]
    fs = _round_up(max(stru_dims), 64)        # stru half-width; packed width 2*fs

    # Dense graph operators, built ONCE; stacked so one DMA ships both.
    adj = build_adj(edge_index, n)
    a_hat = gcn_norm(adj, n)
    graph = jnp.stack([_pad2(a_hat, np_, np_),
                       _pad2(adj, np_, np_)]).astype(jnp.bfloat16)  # [2, Np, Np]

    # Attribute weights / biases.
    gcn_w = jnp.stack([_pad2(w, fp_a, fp_a, jnp.bfloat16) for w, _ in gcn_layers])
    gcn_b = jnp.stack([_pad2(b, 1, fp_a)[0] for _, b in gcn_layers])  # [L, fp_a] f32

    # Structure weights: pack w1|w2 (and b1|b2) so one matmul per GNA layer.
    def pack_w12(w1, w2):
        out = jnp.zeros((fs, 2 * fs), jnp.float32)
        out = out.at[: w1.shape[0], : w1.shape[1]].set(w1)
        out = out.at[: w2.shape[0], fs: fs + w2.shape[1]].set(w2)
        return out.astype(jnp.bfloat16)

    def pack_vecs(b1, b2, av):
        b12 = jnp.zeros((2 * fs,), jnp.float32)
        b12 = b12.at[: b1.shape[1]].set(b1[0])
        b12 = b12.at[fs: fs + b2.shape[1]].set(b2[0])
        a_row = jnp.zeros((2 * fs,), jnp.float32)
        a_row = a_row.at[fs: fs + av.shape[0]].set(av[:, 0])        # a lives in w2 half
        return b12, a_row

    gna_w12 = jnp.stack([pack_w12(w1, w2) for (w1, _, w2, _, _) in gna_layers])
    gna_vec_rows = []
    for (_, b1, _, b2, av) in gna_layers:
        b12, a_row = pack_vecs(b1, b2, av)
        gna_vec_rows += [b12, a_row]
    gna_vec = jnp.stack(gna_vec_rows)                               # [2*L, 2*fs] f32

    arrays = dict(graph=graph, gcn_w=gcn_w, gcn_b=gcn_b,
                  gna_w12=gna_w12, gna_vec=gna_vec)
    meta = dict(
        n=n, np_=np_, fp_a=fp_a, fs=fs,
        n_gcn=n_gcn, n_gcn_enc=n_gcn_enc, n_gna=n_gna, n_gna_enc=n_gna_enc,
        gcn_in_dims=tuple(int(w.shape[0]) for w, _ in gcn_layers),
        gcn_out_dims=tuple(int(w.shape[1]) for w, _ in gcn_layers),
        dim_a=int(gcn_layers[-1][0].shape[1]),
        dim_s=int(gna_layers[-1][0].shape[1]),
        hid_a=int(gcn_layers[n_gcn_enc - 1][0].shape[1]),
        hid_s=int(gna_layers[n_gna_enc - 1][0].shape[1]),
    )
    return arrays, meta


def make_guide_forward(arrays, meta):
    np_, fp_a, fs = meta["np_"], meta["fp_a"], meta["fs"]
    n, dim_a, dim_s = meta["n"], meta["dim_a"], meta["dim_s"]
    hid_a, hid_s = meta["hid_a"], meta["hid_s"]
    n_gcn, n_gna = meta["n_gcn"], meta["n_gna"]

    kernel = functools.partial(
        _guide_fused_kernel,
        n_gcn=n_gcn, n_gcn_enc=meta["n_gcn_enc"],
        n_gna=n_gna, n_gna_enc=meta["n_gna_enc"],
        gcn_in_dims=meta["gcn_in_dims"], gcn_out_dims=meta["gcn_out_dims"],
        fs=fs,
    )

    # Advisory cost estimate for the XLA scheduler.
    flops = (n_gcn * (2 * np_ * np_ * fp_a + 2 * np_ * fp_a * fp_a)
             + n_gna * (2 * np_ * fs * 2 * fs + 2 * np_ * np_ * fs + 8 * np_ * np_))
    transcendentals = n_gna * 2 * np_ * np_           # tanh + exp per GNA layer
    bytes_accessed = (2 * np_ * np_ * 2 + np_ * fp_a * 2 + np_ * fs * 2
                      + n_gcn * fp_a * fp_a * 2 + n_gcn * fp_a * 4
                      + n_gna * fs * 2 * fs * 2 + 2 * n_gna * 2 * fs * 4
                      + 2 * np_ * fp_a * 4 + 2 * np_ * fs * 4)

    call = pl.pallas_call(
        kernel,
        # No grid: single invocation, all operands fully resident in VMEM,
        # no pipeline and therefore no double-buffering.
        out_shape=(jax.ShapeDtypeStruct((2, np_, fp_a), jnp.float32),   # [x_, h_x]
                   jax.ShapeDtypeStruct((2, np_, fs), jnp.float32)),    # [s_, h_s]
        cost_estimate=pl.CostEstimate(
            flops=flops, transcendentals=transcendentals,
            bytes_accessed=bytes_accessed),
    )

    def fwd(x, s):
        x_p = _pad2(x, np_, fp_a, jnp.bfloat16)
        s_p = _pad2(s, np_, fs, jnp.bfloat16)
        attr_out, stru_out = call(arrays["graph"], x_p, s_p,
                                  arrays["gcn_w"], arrays["gcn_b"],
                                  arrays["gna_w12"], arrays["gna_vec"])
        x_ = attr_out[0, :n, :dim_a]
        h_x = attr_out[1, :n, :hid_a]
        s_ = stru_out[0, :n, :dim_s]
        h_s = stru_out[1, :n, :hid_s]
        return x_, s_, (h_x, h_s)

    return jax.jit(fwd)


# ------------------- pure-JAX f32 reference (correctness) --------------------
def guide_forward_ref(params, x, s, edge_index):
    n = x.shape[0]
    adj = build_adj(edge_index, n)
    a_hat = gcn_norm(adj, n)
    gcn_layers = params["attr_enc"] + params["attr_dec"]
    gna_layers = params["stru_enc"] + params["stru_dec"]
    n_gcn_enc = len(params["attr_enc"])
    n_gna_enc = len(params["stru_enc"])

    h, h_x = x, None
    for l, (w, b) in enumerate(gcn_layers):
        y = a_hat @ (h @ w) + b
        last_enc, last_dec = l == n_gcn_enc - 1, l == len(gcn_layers) - 1
        if not (last_enc or last_dec):
            y = jnp.maximum(y, 0.0)
        if last_enc:
            h_x = y
        h = y
    x_ = h

    mask = adj > 0
    h, h_s = s, None
    for l, (w1, b1, w2, b2, av) in enumerate(gna_layers):
        h1 = h @ w1 + b1
        h2 = h @ w2 + b2
        score = h2 @ av                                     # [n, 1]
        logits = jnp.tanh(score - score.T)
        e = jnp.where(mask, jnp.exp(logits), 0.0)
        denom = jnp.sum(e, axis=1, keepdims=True)
        denom = jnp.where(denom > 0, denom, 1.0)
        alpha = e / denom
        y = jnp.maximum(h1 + alpha @ h2, 0.0)
        if l == n_gna_enc - 1:
            h_s = y
        h = y
    s_ = h
    return x_, s_, (h_x, h_s)


# ----------------------------------- main ------------------------------------
if __name__ == "__main__":
    key = jax.random.PRNGKey(0)
    N = 8          # nodes
    DIM_A = 32     # attribute dim
    DIM_S = 6      # structure (node motif degree) dim (selected_motif=True)
    HID_A = 64
    HID_S = 4

    k_x, k_s, k_p = jax.random.split(key, 3)
    x = jax.random.normal(k_x, (N, DIM_A), jnp.float32)
    s = jnp.abs(jax.random.normal(k_s, (N, DIM_S), jnp.float32))

    # ring + two chords, given explicitly as a symmetric (undirected) edge list
    src = jnp.array([0, 1, 2, 3, 4, 5, 6, 7, 0, 2], dtype=jnp.int32)
    dst = jnp.array([1, 2, 3, 4, 5, 6, 7, 0, 4, 6], dtype=jnp.int32)
    edge_index = jnp.stack([jnp.concatenate([src, dst]),
                            jnp.concatenate([dst, src])])

    params = init_guide_params(k_p, DIM_A, DIM_S, HID_A, HID_S, num_layers=4)

    # One-time host/XLA prep (adjacency, normalization, padding, weight packing)
    arrays, meta = prepare_guide(params, edge_index, N)
    guide_forward = make_guide_forward(arrays, meta)

    x_, s_, (h_x, h_s) = guide_forward(x, s)
    jax.block_until_ready((x_, s_, h_x, h_s))

    assert x_.shape == (N, DIM_A) and s_.shape == (N, DIM_S)
    assert h_x.shape == (N, HID_A) and h_s.shape == (N, HID_S)
    assert bool(jnp.all(jnp.isfinite(x_))) and bool(jnp.all(jnp.isfinite(s_)))
    assert bool(jnp.all(jnp.isfinite(h_x))) and bool(jnp.all(jnp.isfinite(h_s)))

    # Loose correctness check against an f32 pure-JAX reference (kernel runs
    # bf16 MXU operands with f32 accumulation, so allow a generous tolerance).
    xr, sr, (hxr, hsr) = guide_forward_ref(params, x, s, edge_index)
    for got, ref in ((x_, xr), (s_, sr), (h_x, hxr), (h_s, hsr)):
        err = float(jnp.max(jnp.abs(got - ref)))
        bound = 5e-2 * (1.0 + float(jnp.max(jnp.abs(ref))))
        assert err <= bound, f"mismatch: max|err|={err} > {bound}"

    print("KERNEL_OK")
</pallas_src>

<mosaic_0001>
module attributes {stable_mosaic.version = 11 : i64} {
  func.func @_guide_fused_kernel(%arg0: memref<2x8x8xbf16, #tpu.memory_space<vmem>>, %arg1: memref<8x128xbf16, #tpu.memory_space<vmem>>, %arg2: memref<8x64xbf16, #tpu.memory_space<vmem>>, %arg3: memref<4x128x128xbf16, #tpu.memory_space<vmem>>, %arg4: memref<4x128xf32, #tpu.memory_space<vmem>>, %arg5: memref<4x64x128xbf16, #tpu.memory_space<vmem>>, %arg6: memref<8x128xf32, #tpu.memory_space<vmem>>, %arg7: memref<2x8x128xf32, #tpu.memory_space<vmem>>, %arg8: memref<2x8x64xf32, #tpu.memory_space<vmem>>) attributes {dimension_semantics = [], scalar_prefetch = 0 : i64, scratch_operands = 0 : i64, tpu.core_type = #tpu.core_type<tc>} {
    %c0 = arith.constant 0 : index
    %c0_0 = arith.constant 0 : index
    %c0_1 = arith.constant 0 : index
    %0 = vector.load %arg0[%c0, %c0_0, %c0_1] : memref<2x8x8xbf16, #tpu.memory_space<vmem>>, vector<1x8x8xbf16>
    %1 = vector.shape_cast %0 : vector<1x8x8xbf16> to vector<8x8xbf16>
    %c1 = arith.constant 1 : index
    %c0_2 = arith.constant 0 : index
    %c0_3 = arith.constant 0 : index
    %2 = vector.load %arg0[%c1, %c0_2, %c0_3] : memref<2x8x8xbf16, #tpu.memory_space<vmem>>, vector<1x8x8xbf16>
    %3 = vector.shape_cast %2 : vector<1x8x8xbf16> to vector<8x8xbf16>
    %cst = arith.constant 0.000000e+00 : bf16
    %4 = vector.broadcast %cst : bf16 to vector<8x8xbf16>
    %5 = arith.cmpf ogt, %3, %4 : vector<8x8xbf16>
    %c0_4 = arith.constant 0 : index
    %c0_5 = arith.constant 0 : index
    %6 = vector.load %arg1[%c0_4, %c0_5] : memref<8x128xbf16, #tpu.memory_space<vmem>>, vector<8x128xbf16>
    %c0_6 = arith.constant 0 : index
    %c0_7 = arith.constant 0 : index
    %c0_8 = arith.constant 0 : index
    %7 = vector.load %arg3[%c0_6, %c0_7, %c0_8] : memref<4x128x128xbf16, #tpu.memory_space<vmem>>, vector<1x128x128xbf16>
    %8 = vector.shape_cast %7 : vector<1x128x128xbf16> to vector<128x128xbf16>
    %c0_9 = arith.constant 0 : index
    %c0_10 = arith.constant 0 : index
    %9 = vector.load %arg4[%c0_9, %c0_10] : memref<4x128xf32, #tpu.memory_space<vmem>>, vector<1x128xf32>
    %10 = vector.shape_cast %9 : vector<1x128xf32> to vector<128xf32>
    %cst_11 = arith.constant dense<0.000000e+00> : vector<8x128xf32>
    %11 = tpu.matmul %1, %6, %cst_11 {dimension_numbers = #tpu.dot_dimension_numbers<[1], [0], [0], [1], [0, 0, 1, 1], [], []>} : vector<8x8xbf16>, vector<8x128xbf16>, vector<8x128xf32> -> vector<8x128xf32>
    %12 = arith.truncf %11 : vector<8x128xf32> to vector<8x128xbf16>
    %cst_12 = arith.constant dense<0.000000e+00> : vector<8x128xf32>
    %13 = tpu.matmul %12, %8, %cst_12 {dimension_numbers = #tpu.dot_dimension_numbers<[1], [0], [0], [1], [0, 0, 1, 1], [], []>} : vector<8x128xbf16>, vector<128x128xbf16>, vector<8x128xf32> -> vector<8x128xf32>
    %14 = vector.shape_cast %10 : vector<128xf32> to vector<1x128xf32>
    %15 = vector.broadcast %14 : vector<1x128xf32> to vector<8x128xf32>
    %16 = arith.addf %13, %15 : vector<8x128xf32>
    %cst_13 = arith.constant 0.000000e+00 : f32
    %17 = vector.broadcast %cst_13 : f32 to vector<8x128xf32>
    %18 = arith.maximumf %16, %17 : vector<8x128xf32>
    %19 = arith.truncf %18 : vector<8x128xf32> to vector<8x128xbf16>
    %c1_14 = arith.constant 1 : index
    %c0_15 = arith.constant 0 : index
    %c0_16 = arith.constant 0 : index
    %20 = vector.load %arg3[%c1_14, %c0_15, %c0_16] : memref<4x128x128xbf16, #tpu.memory_space<vmem>>, vector<1x128x128xbf16>
    %21 = vector.shape_cast %20 : vector<1x128x128xbf16> to vector<128x128xbf16>
    %c1_17 = arith.constant 1 : index
    %c0_18 = arith.constant 0 : index
    %22 = vector.load %arg4[%c1_17, %c0_18] : memref<4x128xf32, #tpu.memory_space<vmem>>, vector<1x128xf32>
    %23 = vector.shape_cast %22 : vector<1x128xf32> to vector<128xf32>
    %cst_19 = arith.constant dense<0.000000e+00> : vector<8x128xf32>
    %24 = tpu.matmul %1, %19, %cst_19 {dimension_numbers = #tpu.dot_dimension_numbers<[1], [0], [0], [1], [0, 0, 1, 1], [], []>} : vector<8x8xbf16>, vector<8x128xbf16>, vector<8x128xf32> -> vector<8x128xf32>
    %25 = arith.truncf %24 : vector<8x128xf32> to vector<8x128xbf16>
    %cst_20 = arith.constant dense<0.000000e+00> : vector<8x128xf32>
    %26 = tpu.matmul %25, %21, %cst_20 {dimension_numbers = #tpu.dot_dimension_numbers<[1], [0], [0], [1], [0, 0, 1, 1], [], []>} : vector<8x128xbf16>, vector<128x128xbf16>, vector<8x128xf32> -> vector<8x128xf32>
    %27 = vector.shape_cast %23 : vector<128xf32> to vector<1x128xf32>
    %28 = vector.broadcast %27 : vector<1x128xf32> to vector<8x128xf32>
    %29 = arith.addf %26, %28 : vector<8x128xf32>
    %c1_21 = arith.constant 1 : index
    %c0_22 = arith.constant 0 : index
    %c0_23 = arith.constant 0 : index
    %30 = vector.load %arg7[%c1_21, %c0_22, %c0_23] : memref<2x8x128xf32, #tpu.memory_space<vmem>>, vector<1x8x128xf32>
    %31 = vector.shape_cast %30 : vector<1x8x128xf32> to vector<8x128xf32>
    %32 = vector.shape_cast %29 : vector<8x128xf32> to vector<1x8x128xf32>
    tpu.vector_store %arg7[%c1_21, %c0_22, %c0_23], %32 {strides = array<i32>} : memref<2x8x128xf32, #tpu.memory_space<vmem>>, vector<1x8x128xf32>,
    %33 = arith.truncf %29 : vector<8x128xf32> to vector<8x128xbf16>
    %c2 = arith.constant 2 : index
    %c0_24 = arith.constant 0 : index
    %c0_25 = arith.constant 0 : index
    %34 = vector.load %arg3[%c2, %c0_24, %c0_25] : memref<4x128x128xbf16, #tpu.memory_space<vmem>>, vector<1x128x128xbf16>
    %35 = vector.shape_cast %34 : vector<1x128x128xbf16> to vector<128x128xbf16>
    %c2_26 = arith.constant 2 : index
    %c0_27 = arith.constant 0 : index
    %36 = vector.load %arg4[%c2_26, %c0_27] : memref<4x128xf32, #tpu.memory_space<vmem>>, vector<1x128xf32>
    %37 = vector.shape_cast %36 : vector<1x128xf32> to vector<128xf32>
    %cst_28 = arith.constant dense<0.000000e+00> : vector<8x128xf32>
    %38 = tpu.matmul %1, %33, %cst_28 {dimension_numbers = #tpu.dot_dimension_numbers<[1], [0], [0], [1], [0, 0, 1, 1], [], []>} : vector<8x8xbf16>, vector<8x128xbf16>, vector<8x128xf32> -> vector<8x128xf32>
    %39 = arith.truncf %38 : vector<8x128xf32> to vector<8x128xbf16>
    %cst_29 = arith.constant dense<0.000000e+00> : vector<8x128xf32>
    %40 = tpu.matmul %39, %35, %cst_29 {dimension_numbers = #tpu.dot_dimension_numbers<[1], [0], [0], [1], [0, 0, 1, 1], [], []>} : vector<8x128xbf16>, vector<128x128xbf16>, vector<8x128xf32> -> vector<8x128xf32>
    %41 = vector.shape_cast %37 : vector<128xf32> to vector<1x128xf32>
    %42 = vector.broadcast %41 : vector<1x128xf32> to vector<8x128xf32>
    %43 = arith.addf %40, %42 : vector<8x128xf32>
    %cst_30 = arith.constant 0.000000e+00 : f32
    %44 = vector.broadcast %cst_30 : f32 to vector<8x128xf32>
    %45 = arith.maximumf %43, %44 : vector<8x128xf32>
    %46 = arith.truncf %45 : vector<8x128xf32> to vector<8x128xbf16>
    %c3 = arith.constant 3 : index
    %c0_31 = arith.constant 0 : index
    %c0_32 = arith.constant 0 : index
    %47 = vector.load %arg3[%c3, %c0_31, %c0_32] : memref<4x128x128xbf16, #tpu.memory_space<vmem>>, vector<1x128x128xbf16>
    %48 = vector.shape_cast %47 : vector<1x128x128xbf16> to vector<128x128xbf16>
    %c3_33 = arith.constant 3 : index
    %c0_34 = arith.constant 0 : index
    %49 = vector.load %arg4[%c3_33, %c0_34] : memref<4x128xf32, #tpu.memory_space<vmem>>, vector<1x128xf32>
    %50 = vector.shape_cast %49 : vector<1x128xf32> to vector<128xf32>
    %cst_35 = arith.constant dense<0.000000e+00> : vector<8x128xf32>
    %51 = tpu.matmul %46, %48, %cst_35 {dimension_numbers = #tpu.dot_dimension_numbers<[1], [0], [0], [1], [0, 0, 1, 1], [], []>} : vector<8x128xbf16>, vector<128x128xbf16>, vector<8x128xf32> -> vector<8x128xf32>
    %52 = arith.truncf %51 : vector<8x128xf32> to vector<8x128xbf16>
    %cst_36 = arith.constant dense<0.000000e+00> : vector<8x128xf32>
    %53 = tpu.matmul %1, %52, %cst_36 {dimension_numbers = #tpu.dot_dimension_numbers<[1], [0], [0], [1], [0, 0, 1, 1], [], []>} : vector<8x8xbf16>, vector<8x128xbf16>, vector<8x128xf32> -> vector<8x128xf32>
    %54 = vector.shape_cast %50 : vector<128xf32> to vector<1x128xf32>
    %55 = vector.broadcast %54 : vector<1x128xf32> to vector<8x128xf32>
    %56 = arith.addf %53, %55 : vector<8x128xf32>
    %c0_37 = arith.constant 0 : index
    %c0_38 = arith.constant 0 : index
    %c0_39 = arith.constant 0 : index
    %57 = vector.load %arg7[%c0_37, %c0_38, %c0_39] : memref<2x8x128xf32, #tpu.memory_space<vmem>>, vector<1x8x128xf32>
    %58 = vector.shape_cast %57 : vector<1x8x128xf32> to vector<8x128xf32>
    %59 = vector.shape_cast %56 : vector<8x128xf32> to vector<1x8x128xf32>
    tpu.vector_store %arg7[%c0_37, %c0_38, %c0_39], %59 {strides = array<i32>} : memref<2x8x128xf32, #tpu.memory_space<vmem>>, vector<1x8x128xf32>,
    %c0_40 = arith.constant 0 : index
    %c0_41 = arith.constant 0 : index
    %60 = vector.load %arg2[%c0_40, %c0_41] : memref<8x64xbf16, #tpu.memory_space<vmem>>, vector<8x64xbf16>
    %c0_42 = arith.constant 0 : index
    %c0_43 = arith.constant 0 : index
    %c0_44 = arith.constant 0 : index
    %61 = vector.load %arg5[%c0_42, %c0_43, %c0_44] : memref<4x64x128xbf16, #tpu.memory_space<vmem>>, vector<1x64x128xbf16>
    %62 = vector.shape_cast %61 : vector<1x64x128xbf16> to vector<64x128xbf16>
    %c0_45 = arith.constant 0 : index
    %c0_46 = arith.constant 0 : index
    %63 = vector.load %arg6[%c0_45, %c0_46] : memref<8x128xf32, #tpu.memory_space<vmem>>, vector<1x128xf32>
    %64 = vector.shape_cast %63 : vector<1x128xf32> to vector<128xf32>
    %c1_47 = arith.constant 1 : index
    %c0_48 = arith.constant 0 : index
    %65 = vector.load %arg6[%c1_47, %c0_48] : memref<8x128xf32, #tpu.memory_space<vmem>>, vector<1x128xf32>
    %66 = vector.shape_cast %65 : vector<1x128xf32> to vector<128xf32>
    %cst_49 = arith.constant dense<0.000000e+00> : vector<8x128xf32>
    %67 = tpu.matmul %60, %62, %cst_49 {dimension_numbers = #tpu.dot_dimension_numbers<[1], [0], [0], [1], [0, 0, 1, 1], [], []>} : vector<8x64xbf16>, vector<64x128xbf16>, vector<8x128xf32> -> vector<8x128xf32>
    %68 = vector.shape_cast %64 : vector<128xf32> to vector<1x128xf32>
    %69 = vector.broadcast %68 : vector<1x128xf32> to vector<8x128xf32>
    %70 = arith.addf %67, %69 : vector<8x128xf32>
    %71 = vector.shape_cast %66 : vector<128xf32> to vector<1x128xf32>
    %72 = vector.broadcast %71 : vector<1x128xf32> to vector<8x128xf32>
    %73 = arith.mulf %70, %72 : vector<8x128xf32>
    %cst_50 = arith.constant dense<0.000000e+00> : vector<8xf32>
    %74 = vector.multi_reduction <add>, %73, %cst_50 [1] : vector<8x128xf32> to vector<8xf32>
    %75 = vector.shape_cast %74 : vector<8xf32> to vector<8x1xf32>
    %76 = tpu.transpose %75, [1, 0] : vector<8x1xf32> -> vector<1x8xf32>
    %77 = vector.broadcast %75 : vector<8x1xf32> to vector<8x8xf32>
    %78 = vector.broadcast %76 : vector<1x8xf32> to vector<8x8xf32>
    %79 = arith.subf %77, %78 : vector<8x8xf32>
    %80 = math.tanh %79 : vector<8x8xf32>
    %cst_51 = arith.constant -1.000000e+30 : f32
    %81 = vector.broadcast %cst_51 : f32 to vector<8x8xf32>
    %82 = arith.select %5, %80, %81 : vector<8x8xi1>, vector<8x8xf32>
    %cst_52 = arith.constant dense<0xFF800000> : vector<8xf32>
    %83 = vector.multi_reduction <maximumf>, %82, %cst_52 [1] : vector<8x8xf32> to vector<8xf32>
    %84 = vector.shape_cast %83 : vector<8xf32> to vector<8x1xf32>
    %cst_53 = arith.constant 0.000000e+00 : f32
    %85 = vector.broadcast %cst_53 : f32 to vector<8x1xf32>
    %86 = arith.maximumf %84, %85 : vector<8x1xf32>
    %87 = vector.broadcast %86 : vector<8x1xf32> to vector<8x8xf32>
    %88 = arith.subf %80, %87 : vector<8x8xf32>
    %89 = math.exp %88 : vector<8x8xf32>
    %cst_54 = arith.constant 0.000000e+00 : f32
    %90 = vector.broadcast %cst_54 : f32 to vector<8x8xf32>
    %91 = arith.select %5, %89, %90 : vector<8x8xi1>, vector<8x8xf32>
    %cst_55 = arith.constant dense<0.000000e+00> : vector<8xf32>
    %92 = vector.multi_reduction <add>, %91, %cst_55 [1] : vector<8x8xf32> to vector<8xf32>
    %93 = vector.shape_cast %92 : vector<8xf32> to vector<8x1xf32>
    %cst_56 = arith.constant 0.000000e+00 : f32
    %94 = vector.broadcast %cst_56 : f32 to vector<8x1xf32>
    %95 = arith.cmpf ogt, %93, %94 : vector<8x1xf32>
    %cst_57 = arith.constant 1.000000e+00 : f32
    %96 = vector.broadcast %cst_57 : f32 to vector<8x1xf32>
    %97 = arith.select %95, %93, %96 : vector<8x1xi1>, vector<8x1xf32>
    %98 = tpu.reciprocal %97 {approx = true} : vector<8x1xf32> -> vector<8x1xf32>
    %99 = vector.broadcast %98 : vector<8x1xf32> to vector<8x8xf32>
    %100 = arith.mulf %91, %99 : vector<8x8xf32>
    %101 = vector.extract_strided_slice %70 {offsets = [0, 0], sizes = [8, 64], strides = [1, 1]} : vector<8x128xf32> to vector<8x64xf32>
    %102 = vector.extract_strided_slice %70 {offsets = [0, 64], sizes = [8, 64], strides = [1, 1]} : vector<8x128xf32> to vector<8x64xf32>
    %103 = arith.truncf %100 : vector<8x8xf32> to vector<8x8xbf16>
    %104 = arith.truncf %102 : vector<8x64xf32> to vector<8x64xbf16>
    %cst_58 = arith.constant dense<0.000000e+00> : vector<8x64xf32>
    %105 = tpu.matmul %103, %104, %cst_58 {dimension_numbers = #tpu.dot_dimension_numbers<[1], [0], [0], [1], [0, 0, 1, 1], [], []>} : vector<8x8xbf16>, vector<8x64xbf16>, vector<8x64xf32> -> vector<8x64xf32>
    %106 = arith.addf %101, %105 : vector<8x64xf32>
    %cst_59 = arith.constant 0.000000e+00 : f32
    %107 = vector.broadcast %cst_59 : f32 to vector<8x64xf32>
    %108 = arith.maximumf %106, %107 : vector<8x64xf32>
    %109 = arith.truncf %108 : vector<8x64xf32> to vector<8x64xbf16>
    %c1_60 = arith.constant 1 : index
    %c0_61 = arith.constant 0 : index
    %c0_62 = arith.constant 0 : index
    %110 = vector.load %arg5[%c1_60, %c0_61, %c0_62] : memref<4x64x128xbf16, #tpu.memory_space<vmem>>, vector<1x64x128xbf16>
    %111 = vector.shape_cast %110 : vector<1x64x128xbf16> to vector<64x128xbf16>
    %c2_63 = arith.constant 2 : index
    %c0_64 = arith.constant 0 : index
    %112 = vector.load %arg6[%c2_63, %c0_64] : memref<8x128xf32, #tpu.memory_space<vmem>>, vector<1x128xf32>
    %113 = vector.shape_cast %112 : vector<1x128xf32> to vector<128xf32>
    %c3_65 = arith.constant 3 : index
    %c0_66 = arith.constant 0 : index
    %114 = vector.load %arg6[%c3_65, %c0_66] : memref<8x128xf32, #tpu.memory_space<vmem>>, vector<1x128xf32>
    %115 = vector.shape_cast %114 : vector<1x128xf32> to vector<128xf32>
    %cst_67 = arith.constant dense<0.000000e+00> : vector<8x128xf32>
    %116 = tpu.matmul %109, %111, %cst_67 {dimension_numbers = #tpu.dot_dimension_numbers<[1], [0], [0], [1], [0, 0, 1, 1], [], []>} : vector<8x64xbf16>, vector<64x128xbf16>, vector<8x128xf32> -> vector<8x128xf32>
    %117 = vector.shape_cast %113 : vector<128xf32> to vector<1x128xf32>
    %118 = vector.broadcast %117 : vector<1x128xf32> to vector<8x128xf32>
    %119 = arith.addf %116, %118 : vector<8x128xf32>
    %120 = vector.shape_cast %115 : vector<128xf32> to vector<1x128xf32>
    %121 = vector.broadcast %120 : vector<1x128xf32> to vector<8x128xf32>
    %122 = arith.mulf %119, %121 : vector<8x128xf32>
    %cst_68 = arith.constant dense<0.000000e+00> : vector<8xf32>
    %123 = vector.multi_reduction <add>, %122, %cst_68 [1] : vector<8x128xf32> to vector<8xf32>
    %124 = vector.shape_cast %123 : vector<8xf32> to vector<8x1xf32>
    %125 = tpu.transpose %124, [1, 0] : vector<8x1xf32> -> vector<1x8xf32>
    %126 = vector.broadcast %124 : vector<8x1xf32> to vector<8x8xf32>
    %127 = vector.broadcast %125 : vector<1x8xf32> to vector<8x8xf32>
    %128 = arith.subf %126, %127 : vector<8x8xf32>
    %129 = math.tanh %128 : vector<8x8xf32>
    %cst_69 = arith.constant -1.000000e+30 : f32
    %130 = vector.broadcast %cst_69 : f32 to vector<8x8xf32>
    %131 = arith.select %5, %129, %130 : vector<8x8xi1>, vector<8x8xf32>
    %cst_70 = arith.constant dense<0xFF800000> : vector<8xf32>
    %132 = vector.multi_reduction <maximumf>, %131, %cst_70 [1] : vector<8x8xf32> to vector<8xf32>
    %133 = vector.shape_cast %132 : vector<8xf32> to vector<8x1xf32>
    %cst_71 = arith.constant 0.000000e+00 : f32
    %134 = vector.broadcast %cst_71 : f32 to vector<8x1xf32>
    %135 = arith.maximumf %133, %134 : vector<8x1xf32>
    %136 = vector.broadcast %135 : vector<8x1xf32> to vector<8x8xf32>
    %137 = arith.subf %129, %136 : vector<8x8xf32>
    %138 = math.exp %137 : vector<8x8xf32>
    %cst_72 = arith.constant 0.000000e+00 : f32
    %139 = vector.broadcast %cst_72 : f32 to vector<8x8xf32>
    %140 = arith.select %5, %138, %139 : vector<8x8xi1>, vector<8x8xf32>
    %cst_73 = arith.constant dense<0.000000e+00> : vector<8xf32>
    %141 = vector.multi_reduction <add>, %140, %cst_73 [1] : vector<8x8xf32> to vector<8xf32>
    %142 = vector.shape_cast %141 : vector<8xf32> to vector<8x1xf32>
    %cst_74 = arith.constant 0.000000e+00 : f32
    %143 = vector.broadcast %cst_74 : f32 to vector<8x1xf32>
    %144 = arith.cmpf ogt, %142, %143 : vector<8x1xf32>
    %cst_75 = arith.constant 1.000000e+00 : f32
    %145 = vector.broadcast %cst_75 : f32 to vector<8x1xf32>
    %146 = arith.select %144, %142, %145 : vector<8x1xi1>, vector<8x1xf32>
    %147 = tpu.reciprocal %146 {approx = true} : vector<8x1xf32> -> vector<8x1xf32>
    %148 = vector.broadcast %147 : vector<8x1xf32> to vector<8x8xf32>
    %149 = arith.mulf %140, %148 : vector<8x8xf32>
    %150 = vector.extract_strided_slice %119 {offsets = [0, 0], sizes = [8, 64], strides = [1, 1]} : vector<8x128xf32> to vector<8x64xf32>
    %151 = vector.extract_strided_slice %119 {offsets = [0, 64], sizes = [8, 64], strides = [1, 1]} : vector<8x128xf32> to vector<8x64xf32>
    %152 = arith.truncf %149 : vector<8x8xf32> to vector<8x8xbf16>
    %153 = arith.truncf %151 : vector<8x64xf32> to vector<8x64xbf16>
    %cst_76 = arith.constant dense<0.000000e+00> : vector<8x64xf32>
    %154 = tpu.matmul %152, %153, %cst_76 {dimension_numbers = #tpu.dot_dimension_numbers<[1], [0], [0], [1], [0, 0, 1, 1], [], []>} : vector<8x8xbf16>, vector<8x64xbf16>, vector<8x64xf32> -> vector<8x64xf32>
    %155 = arith.addf %150, %154 : vector<8x64xf32>
    %cst_77 = arith.constant 0.000000e+00 : f32
    %156 = vector.broadcast %cst_77 : f32 to vector<8x64xf32>
    %157 = arith.maximumf %155, %156 : vector<8x64xf32>
    %c1_78 = arith.constant 1 : index
    %c0_79 = arith.constant 0 : index
    %c0_80 = arith.constant 0 : index
    %158 = vector.load %arg8[%c1_78, %c0_79, %c0_80] : memref<2x8x64xf32, #tpu.memory_space<vmem>>, vector<1x8x64xf32>
    %159 = vector.shape_cast %158 : vector<1x8x64xf32> to vector<8x64xf32>
    %160 = vector.shape_cast %157 : vector<8x64xf32> to vector<1x8x64xf32>
    tpu.vector_store %arg8[%c1_78, %c0_79, %c0_80], %160 {strides = array<i32>} : memref<2x8x64xf32, #tpu.memory_space<vmem>>, vector<1x8x64xf32>,
    %161 = arith.truncf %157 : vector<8x64xf32> to vector<8x64xbf16>
    %c2_81 = arith.constant 2 : index
    %c0_82 = arith.constant 0 : index
    %c0_83 = arith.constant 0 : index
    %162 = vector.load %arg5[%c2_81, %c0_82, %c0_83] : memref<4x64x128xbf16, #tpu.memory_space<vmem>>, vector<1x64x128xbf16>
    %163 = vector.shape_cast %162 : vector<1x64x128xbf16> to vector<64x128xbf16>
    %c4 = arith.constant 4 : index
    %c0_84 = arith.constant 0 : index
    %164 = vector.load %arg6[%c4, %c0_84] : memref<8x128xf32, #tpu.memory_space<vmem>>, vector<1x128xf32>
    %165 = vector.shape_cast %164 : vector<1x128xf32> to vector<128xf32>
    %c5 = arith.constant 5 : index
    %c0_85 = arith.constant 0 : index
    %166 = vector.load %arg6[%c5, %c0_85] : memref<8x128xf32, #tpu.memory_space<vmem>>, vector<1x128xf32>
    %167 = vector.shape_cast %166 : vector<1x128xf32> to vector<128xf32>
    %cst_86 = arith.constant dense<0.000000e+00> : vector<8x128xf32>
    %168 = tpu.matmul %161, %163, %cst_86 {dimension_numbers = #tpu.dot_dimension_numbers<[1], [0], [0], [1], [0, 0, 1, 1], [], []>} : vector<8x64xbf16>, vector<64x128xbf16>, vector<8x128xf32> -> vector<8x128xf32>
    %169 = vector.shape_cast %165 : vector<128xf32> to vector<1x128xf32>
    %170 = vector.broadcast %169 : vector<1x128xf32> to vector<8x128xf32>
    %171 = arith.addf %168, %170 : vector<8x128xf32>
    %172 = vector.shape_cast %167 : vector<128xf32> to vector<1x128xf32>
    %173 = vector.broadcast %172 : vector<1x128xf32> to vector<8x128xf32>
    %174 = arith.mulf %171, %173 : vector<8x128xf32>
    %cst_87 = arith.constant dense<0.000000e+00> : vector<8xf32>
    %175 = vector.multi_reduction <add>, %174, %cst_87 [1] : vector<8x128xf32> to vector<8xf32>
    %176 = vector.shape_cast %175 : vector<8xf32> to vector<8x1xf32>
    %177 = tpu.transpose %176, [1, 0] : vector<8x1xf32> -> vector<1x8xf32>
    %178 = vector.broadcast %176 : vector<8x1xf32> to vector<8x8xf32>
    %179 = vector.broadcast %177 : vector<1x8xf32> to vector<8x8xf32>
    %180 = arith.subf %178, %179 : vector<8x8xf32>
    %181 = math.tanh %180 : vector<8x8xf32>
    %cst_88 = arith.constant -1.000000e+30 : f32
    %182 = vector.broadcast %cst_88 : f32 to vector<8x8xf32>
    %183 = arith.select %5, %181, %182 : vector<8x8xi1>, vector<8x8xf32>
    %cst_89 = arith.constant dense<0xFF800000> : vector<8xf32>
    %184 = vector.multi_reduction <maximumf>, %183, %cst_89 [1] : vector<8x8xf32> to vector<8xf32>
    %185 = vector.shape_cast %184 : vector<8xf32> to vector<8x1xf32>
    %cst_90 = arith.constant 0.000000e+00 : f32
    %186 = vector.broadcast %cst_90 : f32 to vector<8x1xf32>
    %187 = arith.maximumf %185, %186 : vector<8x1xf32>
    %188 = vector.broadcast %187 : vector<8x1xf32> to vector<8x8xf32>
    %189 = arith.subf %181, %188 : vector<8x8xf32>
    %190 = math.exp %189 : vector<8x8xf32>
    %cst_91 = arith.constant 0.000000e+00 : f32
    %191 = vector.broadcast %cst_91 : f32 to vector<8x8xf32>
    %192 = arith.select %5, %190, %191 : vector<8x8xi1>, vector<8x8xf32>
    %cst_92 = arith.constant dense<0.000000e+00> : vector<8xf32>
    %193 = vector.multi_reduction <add>, %192, %cst_92 [1] : vector<8x8xf32> to vector<8xf32>
    %194 = vector.shape_cast %193 : vector<8xf32> to vector<8x1xf32>
    %cst_93 = arith.constant 0.000000e+00 : f32
    %195 = vector.broadcast %cst_93 : f32 to vector<8x1xf32>
    %196 = arith.cmpf ogt, %194, %195 : vector<8x1xf32>
    %cst_94 = arith.constant 1.000000e+00 : f32
    %197 = vector.broadcast %cst_94 : f32 to vector<8x1xf32>
    %198 = arith.select %196, %194, %197 : vector<8x1xi1>, vector<8x1xf32>
    %199 = tpu.reciprocal %198 {approx = true} : vector<8x1xf32> -> vector<8x1xf32>
    %200 = vector.broadcast %199 : vector<8x1xf32> to vector<8x8xf32>
    %201 = arith.mulf %192, %200 : vector<8x8xf32>
    %202 = vector.extract_strided_slice %171 {offsets = [0, 0], sizes = [8, 64], strides = [1, 1]} : vector<8x128xf32> to vector<8x64xf32>
    %203 = vector.extract_strided_slice %171 {offsets = [0, 64], sizes = [8, 64], strides = [1, 1]} : vector<8x128xf32> to vector<8x64xf32>
    %204 = arith.truncf %201 : vector<8x8xf32> to vector<8x8xbf16>
    %205 = arith.truncf %203 : vector<8x64xf32> to vector<8x64xbf16>
    %cst_95 = arith.constant dense<0.000000e+00> : vector<8x64xf32>
    %206 = tpu.matmul %204, %205, %cst_95 {dimension_numbers = #tpu.dot_dimension_numbers<[1], [0], [0], [1], [0, 0, 1, 1], [], []>} : vector<8x8xbf16>, vector<8x64xbf16>, vector<8x64xf32> -> vector<8x64xf32>
    %207 = arith.addf %202, %206 : vector<8x64xf32>
    %cst_96 = arith.constant 0.000000e+00 : f32
    %208 = vector.broadcast %cst_96 : f32 to vector<8x64xf32>
    %209 = arith.maximumf %207, %208 : vector<8x64xf32>
    %210 = arith.truncf %209 : vector<8x64xf32> to vector<8x64xbf16>
    %c3_97 = arith.constant 3 : index
    %c0_98 = arith.constant 0 : index
    %c0_99 = arith.constant 0 : index
    %211 = vector.load %arg5[%c3_97, %c0_98, %c0_99] : memref<4x64x128xbf16, #tpu.memory_space<vmem>>, vector<1x64x128xbf16>
    %212 = vector.shape_cast %211 : vector<1x64x128xbf16> to vector<64x128xbf16>
    %c6 = arith.constant 6 : index
    %c0_100 = arith.constant 0 : index
    %213 = vector.load %arg6[%c6, %c0_100] : memref<8x128xf32, #tpu.memory_space<vmem>>, vector<1x128xf32>
    %214 = vector.shape_cast %213 : vector<1x128xf32> to vector<128xf32>
    %c7 = arith.constant 7 : index
    %c0_101 = arith.constant 0 : index
    %215 = vector.load %arg6[%c7, %c0_101] : memref<8x128xf32, #tpu.memory_space<vmem>>, vector<1x128xf32>
    %216 = vector.shape_cast %215 : vector<1x128xf32> to vector<128xf32>
    %cst_102 = arith.constant dense<0.000000e+00> : vector<8x128xf32>
    %217 = tpu.matmul %210, %212, %cst_102 {dimension_numbers = #tpu.dot_dimension_numbers<[1], [0], [0], [1], [0, 0, 1, 1], [], []>} : vector<8x64xbf16>, vector<64x128xbf16>, vector<8x128xf32> -> vector<8x128xf32>
    %218 = vector.shape_cast %214 : vector<128xf32> to vector<1x128xf32>
    %219 = vector.broadcast %218 : vector<1x128xf32> to vector<8x128xf32>
    %220 = arith.addf %217, %219 : vector<8x128xf32>
    %221 = vector.shape_cast %216 : vector<128xf32> to vector<1x128xf32>
    %222 = vector.broadcast %221 : vector<1x128xf32> to vector<8x128xf32>
    %223 = arith.mulf %220, %222 : vector<8x128xf32>
    %cst_103 = arith.constant dense<0.000000e+00> : vector<8xf32>
    %224 = vector.multi_reduction <add>, %223, %cst_103 [1] : vector<8x128xf32> to vector<8xf32>
    %225 = vector.shape_cast %224 : vector<8xf32> to vector<8x1xf32>
    %226 = tpu.transpose %225, [1, 0] : vector<8x1xf32> -> vector<1x8xf32>
    %227 = vector.broadcast %225 : vector<8x1xf32> to vector<8x8xf32>
    %228 = vector.broadcast %226 : vector<1x8xf32> to vector<8x8xf32>
    %229 = arith.subf %227, %228 : vector<8x8xf32>
    %230 = math.tanh %229 : vector<8x8xf32>
    %cst_104 = arith.constant -1.000000e+30 : f32
    %231 = vector.broadcast %cst_104 : f32 to vector<8x8xf32>
    %232 = arith.select %5, %230, %231 : vector<8x8xi1>, vector<8x8xf32>
    %cst_105 = arith.constant dense<0xFF800000> : vector<8xf32>
    %233 = vector.multi_reduction <maximumf>, %232, %cst_105 [1] : vector<8x8xf32> to vector<8xf32>
    %234 = vector.shape_cast %233 : vector<8xf32> to vector<8x1xf32>
    %cst_106 = arith.constant 0.000000e+00 : f32
    %235 = vector.broadcast %cst_106 : f32 to vector<8x1xf32>
    %236 = arith.maximumf %234, %235 : vector<8x1xf32>
    %237 = vector.broadcast %236 : vector<8x1xf32> to vector<8x8xf32>
    %238 = arith.subf %230, %237 : vector<8x8xf32>
    %239 = math.exp %238 : vector<8x8xf32>
    %cst_107 = arith.constant 0.000000e+00 : f32
    %240 = vector.broadcast %cst_107 : f32 to vector<8x8xf32>
    %241 = arith.select %5, %239, %240 : vector<8x8xi1>, vector<8x8xf32>
    %cst_108 = arith.constant dense<0.000000e+00> : vector<8xf32>
    %242 = vector.multi_reduction <add>, %241, %cst_108 [1] : vector<8x8xf32> to vector<8xf32>
    %243 = vector.shape_cast %242 : vector<8xf32> to vector<8x1xf32>
    %cst_109 = arith.constant 0.000000e+00 : f32
    %244 = vector.broadcast %cst_109 : f32 to vector<8x1xf32>
    %245 = arith.cmpf ogt, %243, %244 : vector<8x1xf32>
    %cst_110 = arith.constant 1.000000e+00 : f32
    %246 = vector.broadcast %cst_110 : f32 to vector<8x1xf32>
    %247 = arith.select %245, %243, %246 : vector<8x1xi1>, vector<8x1xf32>
    %248 = tpu.reciprocal %247 {approx = true} : vector<8x1xf32> -> vector<8x1xf32>
    %249 = vector.broadcast %248 : vector<8x1xf32> to vector<8x8xf32>
    %250 = arith.mulf %241, %249 : vector<8x8xf32>
    %251 = vector.extract_strided_slice %220 {offsets = [0, 0], sizes = [8, 64], strides = [1, 1]} : vector<8x128xf32> to vector<8x64xf32>
    %252 = vector.extract_strided_slice %220 {offsets = [0, 64], sizes = [8, 64], strides = [1, 1]} : vector<8x128xf32> to vector<8x64xf32>
    %253 = arith.truncf %250 : vector<8x8xf32> to vector<8x8xbf16>
    %254 = arith.truncf %252 : vector<8x64xf32> to vector<8x64xbf16>
    %cst_111 = arith.constant dense<0.000000e+00> : vector<8x64xf32>
    %255 = tpu.matmul %253, %254, %cst_111 {dimension_numbers = #tpu.dot_dimension_numbers<[1], [0], [0], [1], [0, 0, 1, 1], [], []>} : vector<8x8xbf16>, vector<8x64xbf16>, vector<8x64xf32> -> vector<8x64xf32>
    %256 = arith.addf %251, %255 : vector<8x64xf32>
    %cst_112 = arith.constant 0.000000e+00 : f32
    %257 = vector.broadcast %cst_112 : f32 to vector<8x64xf32>
    %258 = arith.maximumf %256, %257 : vector<8x64xf32>
    %c0_113 = arith.constant 0 : index
    %c0_114 = arith.constant 0 : index
    %c0_115 = arith.constant 0 : index
    %259 = vector.load %arg8[%c0_113, %c0_114, %c0_115] : memref<2x8x64xf32, #tpu.memory_space<vmem>>, vector<1x8x64xf32>
    %260 = vector.shape_cast %259 : vector<1x8x64xf32> to vector<8x64xf32>
    %261 = vector.shape_cast %258 : vector<8x64xf32> to vector<1x8x64xf32>
    tpu.vector_store %arg8[%c0_113, %c0_114, %c0_115], %261 {strides = array<i32>} : memref<2x8x64xf32, #tpu.memory_space<vmem>>, vector<1x8x64xf32>,
    return
  }
}

</mosaic_0001>

<bundles_post_ra>
// kernel: fwd.1
= control target key start
LH: loop header
LB: loop body
LE: loop exit
PB: predicated region body
PF: predicated region fallthrough
CT: control target
= control target key end

     0   :  { %14 = vsyncpa [#allocation3], 0  ;;  %s2224_s0 = inlined_call_operand.vmem [shape: bf16[2,8,8], index: 0, kind: input, shape index: {}]   ;;  %s2225_s1 = inlined_call_operand.vmem [shape: bf16[8,128], index: 1, kind: input, shape index: {}]   ;;  %s2226_s2 = inlined_call_operand.vmem [shape: bf16[8,64], index: 2, kind: input, shape index: {}]   ;;  %s2227_s3 = inlined_call_operand.hbm [shape: bf16[4,128,128], index: 3, kind: input, shape index: {}]   ;;  %s2228_s4 = inlined_call_operand.vmem [shape: f32[4,128], index: 4, kind: input, shape index: {}]   ;;  %s2229_s5 = inlined_call_operand.hbm [shape: bf16[4,64,128], index: 5, kind: input, shape index: {}]   ;;  %s2230_s6 = inlined_call_operand.vmem [shape: f32[8,128], index: 6, kind: input, shape index: {}]   ;;  %s2231_s7 = inlined_call_operand.vmem [shape: f32[2,8,128], index: 7, kind: output, shape index: {0}]   ;;  %s2232_s8 = inlined_call_operand.vmem [shape: f32[2,8,64], index: 8, kind: output, shape index: {1}]  }
   0x1   :  { %15 = vsyncpa [#allocation5], 0  ;;  %s1942_s27 = smov [#allocation2]  }
   0x2   :  { %s27_s28 = sshll.u32 %s1942_s27, 4  ;;  %s28_s28 = int_to_ptr.vmem [resolvable:$true] %s27_s28 }
   0x3   :  { %s1906_s29 = scalar_lea.vmem %s28_s28, 4096  ;;  %p1911_p1 = scmp.lt.s32.totalorder %s28_s28, %s28_s28 }
   0x4   :  { %p1907_p0 = scmp.ne.s32.totalorder %s28_s28, %s1906_s29  ;;  %p1912_p2 = scmp.lt.s32.totalorder %s1906_s29, %s1906_s29 }
   0x6   :  { %p1913_p3 = por %p1912_p2, %p1911_p1 }
   0x8   :  { %p1914_p4 = pnand %p1913_p3, %p1907_p0 }
   0xa   :  { %1917 = shalt.err (!%p1914_p4)
}
   0xb   :  { %s1943_s30 = smov 64   ;;  %s1944_s9 = smov 4  }
   0xc   :  { %33 = dma.hbm_to_vmem [thread:$0]  %s2227_s3, 4096, %s28_s28, [#allocation3], %s1943_s30, %s1943_s30, %s1944_s9  }
   0xd   :  { %s1945_s12 = smov [#allocation4]  }
   0xe   :  { %s41_s13 = sshll.u32 %s1945_s12, 4  ;;  %s42_s13 = int_to_ptr.vmem [resolvable:$true] %s41_s13 }
   0xf   :  { %s1926_s14 = scalar_lea.vmem %s42_s13, 2048  ;;  %p1931_p6 = scmp.lt.s32.totalorder %s42_s13, %s42_s13 }
  0x10   :  { %p1927_p5 = scmp.ne.s32.totalorder %s42_s13, %s1926_s14  ;;  %p1932_p7 = scmp.lt.s32.totalorder %s1926_s14, %s1926_s14 }
  0x12   :  { %p1933_p8 = por %p1932_p7, %p1931_p6 }
  0x14   :  { %p1934_p9 = pnand %p1933_p8, %p1927_p5 }
  0x16   :  { %1937 = shalt.err (!%p1934_p9)
}
  0x17   :  { %47 = dma.hbm_to_vmem [thread:$0]  %s2229_s5, 2048, %s42_s13, [#allocation5], %s1943_s30, %s1943_s30, %s1944_s9  }
  0x18   :  { %1938 = dma.done.wait [#allocation3], 4096  }
  0x19   :  { %1939 = vsyncadd [#allocation3], 4294963200 }
  0x1a   :  { %1940 = dma.done.wait [#allocation5], 2048  }
  0x1b   :  { %1941 = vsyncadd [#allocation5], 4294965248  ;;  %v1946_v0 = vmov 0.0   ;;  %vm1947_vm0 = vmmov 0   ;;  %vm85_vm1 = vcmask 1043456   ;;  %vm81_vm2 = vcmask 64512  }
  0x1c   :  { %1643 = vmatprep.subr.bf16.mxu0 %v1946_v0  ;;  %1645 = vmatprep.mubr.msk.bf16.mxu0 %vm1947_vm0, %v1946_v0  ;;  %v63_v1 = vld [vmem:[%s2225_s1] sm:$0xf]  ;;  %v1826_v3 = vld [vmem:[#allocation2 + $0x38] sm:$0xff]   ;;  %v1827_v5 = vld [vmem:[#allocation2 + $0x30] sm:$0xff]   ;;  %vm731_vm3 = vcmask 523264  }
  0x1d   :  { %1649 = vmatprep.subr.bf16.mxu1 %v1946_v0  ;;  %1665 = vmatprep.mubr.msk.bf16.mxu1 %vm1947_vm0, %v1946_v0  ;;  %v87_v2 = vsel %vm85_vm1, %v63_v1, 0  ;;  %v2017_v4 = vld [vmem:[%s2224_s0] sm:$0xf]  ;;  %v1828_v6 = vld [vmem:[#allocation2 + $0x28] sm:$0xff]   ;;  %v1830_v8 = vld [vmem:[#allocation2 + $0x18] sm:$0xff]  }
  0x1e   :  { %1644 = vmatpush3.bf16.msra.mxu0 %v87_v2  ;;  %1650 = vmatpush3.bf16.msra.mxu1 %v1826_v3  ;;  %v1829_v7 = vld [vmem:[#allocation2 + $0x20] sm:$0xff]   ;;  %v1831_v9 = vld [vmem:[#allocation2 + $0x10] sm:$0xff]   ;;  %v1832_v10 = vld [vmem:[#allocation2 + $0x8] sm:$0xff]  }
  0x1f   :  { %1669 = vmatprep.subr.bf16.mxu0 %v1946_v0  ;;  %1651 = vmatprep.subr.bf16.mxu1 %v1946_v0  ;;  %v1833_v11 = vld [vmem:[#allocation2] sm:$0xff]   ;;  %v1834_v26 = vld [vmem:[#allocation2 + $0x78] sm:$0xff]   ;;  %v1835_v27 = vld [vmem:[#allocation2 + $0x70] sm:$0xff]  }
  0x20   :  { %v1498_v17 = vld [vmem:[%s2228_s4] ss:$0 sm:$0xff]  ;;  %v1836_v28 = vld [vmem:[#allocation2 + $0x68] sm:$0xff]   ;;  %v1838_v30 = vld [vmem:[#allocation2 + $0x58] sm:$0xff]  }
  0x21   :  { %1646 = vmatmul.mubr.msk.bf16.vlgmr.msra.gmra.mxu0 %vm81_vm2, %v2017_v4  ;;  %v1837_v29 = vld [vmem:[#allocation2 + $0x60] sm:$0xff]   ;;  %v1839_v31 = vld [vmem:[#allocation2 + $0x50] sm:$0xff]   ;;  %v1840_v32 = vld [vmem:[#allocation2 + $0x48] sm:$0xff]  }
  0x22   :  { %1671 = vmatprep.mubr.msk.bf16.mxu0 %vm1947_vm0, %v1946_v0  ;;  %1652 = vmatpush3.bf16.msra.mxu1 %v1827_v5  ;;  %v1841_v33 = vld [vmem:[#allocation2 + $0x40] sm:$0xff]   ;;  %v1842_v47 = vld [vmem:[#allocation2 + $0xb8] sm:$0xff]   ;;  %v1843_v48 = vld [vmem:[#allocation2 + $0xb0] sm:$0xff]  }
  0x23   :  { %1653 = vmatprep.subr.bf16.mxu1 %v1946_v0  ;;  %v1508_v39 = vld [vmem:[%s2228_s4 + $0x1] ss:$0 sm:$0xff]  ;;  %v1844_v49 = vld [vmem:[#allocation2 + $0xa8] sm:$0xff]   ;;  %v1846_v51 = vld [vmem:[#allocation2 + $0x98] sm:$0xff]  }
  0x24   :  { %v1845_v50 = vld [vmem:[#allocation2 + $0xa0] sm:$0xff]   ;;  %v1847_v52 = vld [vmem:[#allocation2 + $0x90] sm:$0xff]   ;;  %v1848_v53 = vld [vmem:[#allocation2 + $0x88] sm:$0xff]  }
  0x25   :  { %v1849_v54 = vld [vmem:[#allocation2 + $0x80] sm:$0xff]   ;;  %v1850_v55 = vld [vmem:[#allocation2 + $0xf8] sm:$0xff]   ;;  %v1851_v56 = vld [vmem:[#allocation2 + $0xf0] sm:$0xff]  }
  0x26   :  { %1654 = vmatpush3.bf16.msra.mxu1 %v1828_v6  ;;  %v1852_v57 = vld [vmem:[#allocation2 + $0xe8] sm:$0xff]   ;;  %v1853_v58 = vld [vmem:[#allocation2 + $0xe0] sm:$0xff]   ;;  %v1854_v59 = vld [vmem:[#allocation2 + $0xd8] sm:$0xff]  }
  0x27   :  { %1655 = vmatprep.subr.bf16.mxu1 %v1946_v0  ;;  %v1855_v60 = vld [vmem:[#allocation2 + $0xd0] sm:$0xff]   ;;  %v1856_v61 = vld [vmem:[#allocation2 + $0xc8] sm:$0xff]   ;;  %v1857_v5 = vld [vmem:[#allocation2 + $0xc0] sm:$0xff]  }
  0x28   :  { %v1519_v6 = vld [vmem:[%s2228_s4 + $0x2] ss:$0 sm:$0xff] }
  0x2a   :  { %1656 = vmatpush3.bf16.msra.mxu1 %v1829_v7 }
  0x2b   :  { %1657 = vmatprep.subr.bf16.mxu1 %v1946_v0 }
  0x2e   :  { %1658 = vmatpush3.bf16.msra.mxu1 %v1830_v8 }
  0x2f   :  { %1659 = vmatprep.subr.bf16.mxu1 %v1946_v0 }
  0x32   :  { %1660 = vmatpush3.bf16.msra.mxu1 %v1831_v9 }
  0x33   :  { %1661 = vmatprep.subr.bf16.mxu1 %v1946_v0 }
  0x36   :  { %1662 = vmatpush3.bf16.msra.mxu1 %v1832_v10 }
  0x37   :  { %1663 = vmatprep.subr.bf16.mxu1 %v1946_v0 }
  0x3a   :  { %1664 = vmatpush3.bf16.msra.mxu1 %v1833_v11 }
  0x3b   :  { %1695 = vmatprep.subr.bf16.mxu1 %v1946_v0 }
  0xe1   :  { %v123_v12 = vpop.f32.mrf.mxu0 }
  0xe2   :  { %v129_v13 = vpack.c.bf16 %v123_v12, %v123_v12  ;;  %v1858_v12 = vld [vmem:[#allocation4 + $0x18] sm:$0xff]  }
  0xe3   :  { %v1647_v14 = vpop.f32.mrf.mxu0 }
  0xe4   :  { %1666 = vmatmul.mubr.bf16.vlgmr.msra.gmra.mxu1 %v129_v13 }
  0xe5   :  { %v126_v15 = vpop.f32.mrf.mxu0  ;;  %1697 = vmatprep.mubr.msk.bf16.mxu1 %vm1947_vm0, %v1946_v0 }
  0xe6   :  { %v1859_v15 = vld [vmem:[#allocation4 + $0x10] sm:$0xff]  }
  0xe7   :  { %v1648_v16 = vpop.f32.mrf.mxu0 }
  0xe8   :  { %v1860_v16 = vld [vmem:[#allocation4 + $0x8] sm:$0xff]  }
 0x1a4   :  { %v216_v18 = vpop.f32.mrf.mxu1 }
 0x1a5   :  { %v217_v19 = vadd.f32 %v1498_v17, %v216_v18  ;;  %v1861_v17 = vld [vmem:[#allocation4] sm:$0xff]  }
 0x1a6   :  { %v1667_v20 = vpop.f32.mrf.mxu1  ;;  %v692_v18 = vld [vmem:[%s2226_s2] sm:$0xf] }
 0x1a7   :  { %v222_v21 = vmax.f32 %v217_v19, 0.0 }
 0x1a8   :  { %v219_v22 = vpop.f32.mrf.mxu1 }
 0x1a9   :  { %v223_v23 = vpack.c.bf16 %v222_v21, %v222_v21 }
 0x1aa   :  { %v1668_v24 = vpop.f32.mrf.mxu1 }
 0x1ab   :  { %v243_v25 = vsel %vm85_vm1, %v223_v23, 0 }
 0x1ac   :  { %1670 = vmatpush3.bf16.msra.mxu0 %v243_v25  ;;  %v1538_v25 = vld [vmem:[%s2230_s6] ss:$0 sm:$0xff] }
 0x1ad   :  { %1675 = vmatprep.subr.bf16.mxu0 %v1946_v0 }
 0x1af   :  { %1672 = vmatmul.mubr.msk.bf16.vlgmr.msra.gmra.mxu0 %vm81_vm2, %v2017_v4 }
 0x1b0   :  { %1676 = vmatpush3.bf16.msra.mxu0 %v1834_v26  ;;  %1691 = vmatprep.mubr.msk.bf16.mxu0 %vm1947_vm0, %v1946_v0 }
 0x1b1   :  { %1677 = vmatprep.subr.bf16.mxu0 %v1946_v0 }
 0x1b4   :  { %1678 = vmatpush3.bf16.msra.mxu0 %v1835_v27  ;;  %v1544_v27 = vld [vmem:[%s2230_s6 + $0x1] ss:$0 sm:$0xff] }
 0x1b5   :  { %1679 = vmatprep.subr.bf16.mxu0 %v1946_v0 }
 0x1b8   :  { %1680 = vmatpush3.bf16.msra.mxu0 %v1836_v28 }
 0x1b9   :  { %1681 = vmatprep.subr.bf16.mxu0 %v1946_v0 }
 0x1bc   :  { %1682 = vmatpush3.bf16.msra.mxu0 %v1837_v29 }
 0x1bd   :  { %1683 = vmatprep.subr.bf16.mxu0 %v1946_v0 }
 0x1c0   :  { %1684 = vmatpush3.bf16.msra.mxu0 %v1838_v30 }
 0x1c1   :  { %1685 = vmatprep.subr.bf16.mxu0 %v1946_v0 }
 0x1c4   :  { %1686 = vmatpush3.bf16.msra.mxu0 %v1839_v31 }
 0x1c5   :  { %1687 = vmatprep.subr.bf16.mxu0 %v1946_v0 }
 0x1c8   :  { %1688 = vmatpush3.bf16.msra.mxu0 %v1840_v32 }
 0x1c9   :  { %1689 = vmatprep.subr.bf16.mxu0 %v1946_v0 }
 0x1cc   :  { %1690 = vmatpush3.bf16.msra.mxu0 %v1841_v33  ;;  %v814_v33 = vlaneseq }
 0x1cd   :  { %1721 = vmatprep.subr.bf16.mxu0 %v1946_v0 }
 0x26f   :  { %v279_v34 = vpop.f32.mrf.mxu0 }
 0x270   :  { %v285_v35 = vpack.c.bf16 %v279_v34, %v279_v34  ;;  %v815_v34 = vshrl.u32 %v814_v33, 7 }
 0x271   :  { %v1673_v36 = vpop.f32.mrf.mxu0 }
 0x272   :  { %1692 = vmatmul.mubr.bf16.vlgmr.msra.gmra.mxu0 %v285_v35  ;;  %v2113_v35 = vsub.s32 0, %v815_v34 }
 0x273   :  { %v282_v37 = vpop.f32.mrf.mxu0  ;;  %1737 = vmatprep.mubr.msk.bf16.mxu0 %vm1947_vm0, %v1946_v0  ;;  %1722 = vmatpush3.bf16.msra.mxu0 %v1850_v55  ;;  %v1536_v55 = vld [vmem:[%s2228_s4 + $0x3] ss:$0 sm:$0xff] }
 0x274   :  { %1723 = vmatprep.subr.bf16.mxu0 %v1946_v0 }
 0x275   :  { %v1674_v38 = vpop.f32.mrf.mxu0 }
 0x277   :  { %1724 = vmatpush3.bf16.msra.mxu0 %v1851_v56 }
 0x278   :  { %1725 = vmatprep.subr.bf16.mxu0 %v1946_v0 }
 0x27b   :  { %1726 = vmatpush3.bf16.msra.mxu0 %v1852_v57 }
 0x27c   :  { %1727 = vmatprep.subr.bf16.mxu0 %v1946_v0 }
 0x27f   :  { %1728 = vmatpush3.bf16.msra.mxu0 %v1853_v58 }
 0x280   :  { %1729 = vmatprep.subr.bf16.mxu0 %v1946_v0 }
 0x283   :  { %1730 = vmatpush3.bf16.msra.mxu0 %v1854_v59 }
 0x284   :  { %1731 = vmatprep.subr.bf16.mxu0 %v1946_v0 }
 0x287   :  { %1732 = vmatpush3.bf16.msra.mxu0 %v1855_v60 }
 0x288   :  { %1733 = vmatprep.subr.bf16.mxu0 %v1946_v0 }
 0x28b   :  { %1734 = vmatpush3.bf16.msra.mxu0 %v1856_v61 }
 0x28c   :  { %1735 = vmatprep.subr.bf16.mxu0 %v1946_v0 }
 0x28f   :  { %1736 = vmatpush3.bf16.msra.mxu0 %v1857_v5  ;;  %v1862_v5 = vld [vmem:[#allocation4 + $0x38] sm:$0xff]  }
 0x290   :  { %1747 = vmatprep.subr.bf16.mxu0 %v1946_v0 }
 0x332   :  { %v372_v40 = vpop.f32.mrf.mxu0 }
 0x333   :  { %v373_v41 = vadd.f32 %v1508_v39, %v372_v40  ;;  %v1496_v39 = vld [vmem:[%s2224_s0 + $0x4] sm:$0xf]  ;;  %v1948_v40 = vmov 0  }
 0x334   :  { %v1693_v42 = vpop.f32.mrf.mxu0  ;;  %vm62_vm4 = vcmp.gt.bf16.partialorder %v1496_v39, 0 }
 0x335   :  { %1517 = vst [vmem:[%s2231_s7 + $0x8] sm:$0xff] %v373_v41  ;;  %v380_v43 = vpack.c.bf16 %v373_v41, %v373_v41  ;;  %v820_v41 = vsel %vm62_vm4, 65537, %v1948_v40 }
 0x336   :  { %v375_v44 = vpop.f32.mrf.mxu0  ;;  %v821_v42 = vunpack.c.l.b16 %v820_v41 }
 0x337   :  { %v400_v45 = vsel %vm85_vm1, %v380_v43, 0 }
 0x338   :  { %v1694_v46 = vpop.f32.mrf.mxu0  ;;  %1696 = vmatpush3.bf16.msra.mxu1 %v400_v45  ;;  %vm2119_vm5 = vcmp.ne.s32.totalorder %v821_v42, 0 }
 0x339   :  { %1701 = vmatprep.subr.bf16.mxu1 %v1946_v0 }
 0x33b   :  { %1698 = vmatmul.mubr.msk.bf16.vlgmr.msra.gmra.mxu1 %vm81_vm2, %v2017_v4 }
 0x33c   :  { %1702 = vmatpush3.bf16.msra.mxu1 %v1842_v47  ;;  %1717 = vmatprep.mubr.msk.bf16.mxu1 %vm1947_vm0, %v1946_v0 }
 0x33d   :  { %1703 = vmatprep.subr.bf16.mxu1 %v1946_v0 }
 0x340   :  { %1704 = vmatpush3.bf16.msra.mxu1 %v1843_v48 }
 0x341   :  { %1705 = vmatprep.subr.bf16.mxu1 %v1946_v0 }
 0x344   :  { %1706 = vmatpush3.bf16.msra.mxu1 %v1844_v49 }
 0x345   :  { %1707 = vmatprep.subr.bf16.mxu1 %v1946_v0 }
 0x348   :  { %1708 = vmatpush3.bf16.msra.mxu1 %v1845_v50 }
 0x349   :  { %1709 = vmatprep.subr.bf16.mxu1 %v1946_v0 }
 0x34c   :  { %1710 = vmatpush3.bf16.msra.mxu1 %v1846_v51 }
 0x34d   :  { %1711 = vmatprep.subr.bf16.mxu1 %v1946_v0 }
 0x350   :  { %1712 = vmatpush3.bf16.msra.mxu1 %v1847_v52 }
 0x351   :  { %1713 = vmatprep.subr.bf16.mxu1 %v1946_v0 }
 0x354   :  { %1714 = vmatpush3.bf16.msra.mxu1 %v1848_v53 }
 0x355   :  { %1715 = vmatprep.subr.bf16.mxu1 %v1946_v0 }
 0x358   :  { %1716 = vmatpush3.bf16.msra.mxu1 %v1849_v54 }
 0x359   :  { %1741 = vmatprep.subr.bf16.mxu1 %v1946_v0 }
 0x3fb   :  { %v436_v62 = vpop.f32.mrf.mxu1 }
 0x3fc   :  { %v442_v63 = vpack.c.bf16 %v436_v62, %v436_v62 }
 0x3fd   :  { %v1699_v1 = vpop.f32.mrf.mxu1 }
 0x3fe   :  { %1718 = vmatmul.mubr.bf16.vlgmr.msra.gmra.mxu1 %v442_v63 }
 0x3ff   :  { %v439_v2 = vpop.f32.mrf.mxu1  ;;  %1743 = vmatprep.mubr.msk.bf16.mxu1 %vm1947_vm0, %v1946_v0 }
 0x401   :  { %v1700_v3 = vpop.f32.mrf.mxu1 }
 0x4be   :  { %v529_v7 = vpop.f32.mrf.mxu1 }
 0x4bf   :  { %v530_v8 = vadd.f32 %v1519_v6, %v529_v7  ;;  %v1863_v7 = vld [vmem:[#allocation4 + $0x30] sm:$0xff]  }
 0x4c0   :  { %v1719_v9 = vpop.f32.mrf.mxu1 }
 0x4c1   :  { %v535_v10 = vmax.f32 %v530_v8, 0.0  ;;  %v1864_v8 = vld [vmem:[#allocation4 + $0x28] sm:$0xff]   ;;  %v1865_v9 = vld [vmem:[#allocation4 + $0x20] sm:$0xff]  }
 0x4c2   :  { %v532_v11 = vpop.f32.mrf.mxu1 }
 0x4c3   :  { %v536_v13 = vpack.c.bf16 %v535_v10, %v535_v10 }
 0x4c4   :  { %v1720_v14 = vpop.f32.mrf.mxu1 }
 0x4c5   :  { %1738 = vmatmul.mubr.bf16.vlgmr.msra.gmra.mxu0 %v536_v13 }
 0x4c6   :  { %1748 = vmatpush3.bf16.msra.mxu0 %v1858_v12  ;;  %1755 = vmatprep.mubr.msk.bf16.mxu0 %vm1947_vm0, %v1946_v0 }
 0x4c7   :  { %1749 = vmatprep.subr.bf16.mxu0 %v1946_v0 }
 0x4ca   :  { %1750 = vmatpush3.bf16.msra.mxu0 %v1859_v15 }
 0x4cb   :  { %1751 = vmatprep.subr.bf16.mxu0 %v1946_v0 }
 0x4ce   :  { %1752 = vmatpush3.bf16.msra.mxu0 %v1860_v16 }
 0x4cf   :  { %1753 = vmatprep.subr.bf16.mxu0 %v1946_v0 }
 0x4d2   :  { %1754 = vmatpush3.bf16.msra.mxu0 %v1861_v17  ;;  %v1546_v17 = vld [vmem:[%s2230_s6 + $0x2] ss:$0 sm:$0xff] }
 0x4d3   :  { %1777 = vmatprep.subr.bf16.mxu0 %v1946_v0 }
 0x4d5   :  { %1756 = vmatmul.mubr.msk.bf16.vlgmr.msra.gmra.mxu0 %vm731_vm3, %v692_v18 }
 0x4d6   :  { %1779 = vmatprep.mubr.msk.bf16.mxu0 %vm1947_vm0, %v1946_v0 }
 0x585   :  { %v637_v19 = vpop.f32.mrf.mxu0 }
 0x586   :  { %v643_v20 = vpack.c.bf16 %v637_v19, %v637_v19  ;;  %v1552_v19 = vld [vmem:[%s2230_s6 + $0x3] ss:$0 sm:$0xff] }
 0x587   :  { %v1739_v21 = vpop.f32.mrf.mxu0 }
 0x588   :  { %v649_v22 = vsel %vm85_vm1, %v643_v20, 0 }
 0x589   :  { %v640_v23 = vpop.f32.mrf.mxu0  ;;  %1742 = vmatpush3.bf16.msra.mxu1 %v649_v22 }
 0x58a   :  { %1759 = vmatprep.subr.bf16.mxu1 %v1946_v0 }
 0x58b   :  { %v1740_v24 = vpop.f32.mrf.mxu0 }
 0x58c   :  { %1744 = vmatmul.mubr.msk.bf16.vlgmr.msra.gmra.mxu1 %vm81_vm2, %v2017_v4 }
 0x58d   :  { %1761 = vmatprep.mubr.msk.bf16.mxu1 %vm1947_vm0, %v1946_v0 }
 0x595   :  { %v769_v26 = vpop.f32.mrf.mxu0 }
 0x596   :  { %v2110_v28 = vadd.f32 %v1538_v25, %v769_v26 }
 0x597   :  { %v1757_v29 = vpop.f32.mrf.mxu0 }
 0x598   :  { %v779_v30 = vmul.f32 %v1544_v27, %v2110_v28  ;;  %v840_v54 = vpack.c.bf16 %v2110_v28, %v2110_v28 }
 0x599   :  { %v772_v31 = vpop.f32.mrf.mxu0 }
 0x59a   :  { %780 = vadd.xlane.f32.xlu0 %v779_v30 }
 0x59b   :  { %v1758_v4 = vpop.f32.mrf.mxu0 }
 0x623   :  { %v781_v32 = vpop.xlane.xlu0 %780 }
 0x624   :  { %782 = vxpose.xlu0.b32.start.end [1/1] (short) (narrow) %v781_v32, 8 }
 0x64c   :  { %v685_v56 = vpop.f32.mrf.mxu1 }
 0x64d   :  { %v686_v57 = vadd.f32 %v1536_v55, %v685_v56 }
 0x64e   :  { %v1745_v58 = vpop.f32.mrf.mxu1 }
 0x64f   :  { %691 = vst [vmem:[%s2231_s7] sm:$0xff] %v686_v57 }
 0x650   :  { %v688_v59 = vpop.f32.mrf.mxu1 }
 0x651   :  { %v1555_v59 = vld [vmem:[%s2230_s6 + $0x4] ss:$0 sm:$0xff] }
 0x652   :  { %v1746_v60 = vpop.f32.mrf.mxu1 }
 0x6a0   :  { %v798_v36 = vpop.trf.xlu0 }
 0x6a1   :  { %v817_v37 = vrot.slane %v798_v36, %v2113_v35 }
 0x6a3   :  { %v818_v38 = vsub.f32 %v781_v32, %v817_v37 }
 0x6a5   :  { %1874 = vtanh.f32 %v818_v38 }
 0x6b2   :  { %v1875_v44 = vpop.eup %1874 }
 0x6b3   :  { %v823_v45 = vsel %vm2119_vm5, %v1875_v44, -1e+30 }
 0x6b4   :  { %v824_v46 = vsel %vm81_vm2, %v823_v45, -inf }
 0x6b5   :  { %825 = vmax.xlane.f32.xlu1 %v824_v46 }
 0x73e   :  { %v826_v47 = vpop.xlane.xlu1 %825 }
 0x73f   :  { %v827_v48 = vmax.f32 %v826_v47, 0.0  ;;  %v1866_v47 = vld [vmem:[#allocation4 + $0x58] sm:$0xff]  }
 0x741   :  { %v828_v49 = vsub.f32 %v1875_v44, %v827_v48 }
 0x743   :  { %v829_v50 = vmul.f32 1.442695, %v828_v49  ;;  %v1867_v49 = vld [vmem:[#allocation4 + $0x50] sm:$0xff]  }
 0x745   :  { %1876 = vpow2.f32 %v829_v50  ;;  %v1868_v50 = vld [vmem:[#allocation4 + $0x48] sm:$0xff]  }
 0x752   :  { %v1877_v51 = vpop.eup %1876 }
 0x753   :  { %v831_v52 = vsel %vm2119_vm5, %v1877_v51, 0.0  ;;  %v1869_v51 = vld [vmem:[#allocation4 + $0x40] sm:$0xff]  }
 0x754   :  { %v832_v53 = vsel %vm81_vm2, %v831_v52, 0.0 }
 0x755   :  { %833 = vadd.xlane.f32.xlu1 %v832_v53 }
 0x766   :  { %842 = vrot.lane.b32.xlu1 %v840_v54, %s1943_s30 }
 0x7de   :  { %v834_v61 = vpop.xlane.xlu1 %833 }
 0x7df   :  { %vm835_vm6 = vcmp.gt.f32.partialorder %v834_v61, 0.0 }
 0x7e0   :  { %v836_v62 = vsel %vm835_vm6, %v834_v61, 1.0  ;;  %v1561_v61 = vld [vmem:[%s2230_s6 + $0x5] ss:$0 sm:$0xff] }
 0x7e1   :  { %1878 = vrcp.f32 %v836_v62 }
 0x7e2   :  { %v843_v63 = vpop.permute.xlu1 %842 }
 0x7e3   :  { %v848_v1 = vsel %vm85_vm1, %v843_v63, 0 }
 0x7e4   :  { %1760 = vmatpush3.bf16.msra.mxu1 %v848_v1 }
 0x7e5   :  { %1765 = vmatprep.subr.bf16.mxu1 %v1946_v0 }
 0x7ee   :  { %v1879_v2 = vpop.eup %1878 }
 0x7ef   :  { %v838_v3 = vmul.f32 %v1879_v2, %v831_v52 }
 0x7f1   :  { %v839_v6 = vpack.c.bf16 %v838_v3, %v838_v3 }
 0x7f3   :  { %1762 = vmatmul.mubr.msk.bf16.vlgmr.msra.gmra.mxu1 %vm81_vm2, %v839_v6 }
 0x7f4   :  { %1766 = vmatpush3.bf16.msra.mxu1 %v1862_v5  ;;  %1773 = vmatprep.mubr.msk.bf16.mxu1 %vm1947_vm0, %v1946_v0 }
 0x7f5   :  { %1767 = vmatprep.subr.bf16.mxu1 %v1946_v0 }
 0x7f8   :  { %1768 = vmatpush3.bf16.msra.mxu1 %v1863_v7 }
 0x7f9   :  { %1769 = vmatprep.subr.bf16.mxu1 %v1946_v0 }
 0x7fc   :  { %1770 = vmatpush3.bf16.msra.mxu1 %v1864_v8 }
 0x7fd   :  { %1771 = vmatprep.subr.bf16.mxu1 %v1946_v0 }
 0x800   :  { %1772 = vmatpush3.bf16.msra.mxu1 %v1865_v9 }
 0x801   :  { %1795 = vmatprep.subr.bf16.mxu1 %v1946_v0 }
 0x8b3   :  { %v884_v10 = vpop.f32.mrf.mxu1 }
 0x8b4   :  { %v890_v11 = vadd.f32 %v884_v10, %v2110_v28 }
 0x8b5   :  { %v1763_v12 = vpop.f32.mrf.mxu1 }
 0x8b6   :  { %v891_v13 = vmax.f32 %v890_v11, 0.0 }
 0x8b7   :  { %v887_v14 = vpop.f32.mrf.mxu1 }
 0x8b8   :  { %v892_v15 = vpack.c.bf16 %v891_v13, %v891_v13 }
 0x8b9   :  { %v1764_v16 = vpop.f32.mrf.mxu1 }
 0x8ba   :  { %1774 = vmatmul.mubr.msk.bf16.vlgmr.msra.gmra.mxu1 %vm731_vm3, %v892_v15 }
 0x8bb   :  { %1797 = vmatprep.mubr.msk.bf16.mxu1 %vm1947_vm0, %v1946_v0 }
 0x97a   :  { %v969_v18 = vpop.f32.mrf.mxu1 }
 0x97b   :  { %v970_v20 = vadd.f32 %v1546_v17, %v969_v18 }
 0x97c   :  { %v1775_v21 = vpop.f32.mrf.mxu1 }
 0x97d   :  { %v979_v22 = vmul.f32 %v1552_v19, %v970_v20  ;;  %v1037_v39 = vpack.c.bf16 %v970_v20, %v970_v20 }
 0x97e   :  { %v972_v23 = vpop.f32.mrf.mxu1 }
 0x97f   :  { %980 = vadd.xlane.f32.xlu1 %v979_v22 }
 0x980   :  { %v1776_v24 = vpop.f32.mrf.mxu1 }
 0xa08   :  { %v981_v25 = vpop.xlane.xlu1 %980 }
 0xa09   :  { %982 = vxpose.xlu0.b32.start.end [1/1] (short) (narrow) %v981_v25, 8 }
 0xa85   :  { %v998_v26 = vpop.trf.xlu0 }
 0xa86   :  { %v1017_v27 = vrot.slane %v998_v26, %v2113_v35  ;;  %v1870_v26 = vld [vmem:[#allocation4 + $0x78] sm:$0xff]  }
 0xa88   :  { %v1018_v28 = vsub.f32 %v981_v25, %v1017_v27 }
 0xa8a   :  { %1880 = vtanh.f32 %v1018_v28  ;;  %v1871_v28 = vld [vmem:[#allocation4 + $0x70] sm:$0xff]  }
 0xa97   :  { %v1881_v29 = vpop.eup %1880 }
 0xa98   :  { %v1020_v30 = vsel %vm2119_vm5, %v1881_v29, -1e+30 }
 0xa99   :  { %v1021_v31 = vsel %vm81_vm2, %v1020_v30, -inf  ;;  %v1873_v30 = vld [vmem:[#allocation4 + $0x60] sm:$0xff]  }
 0xa9a   :  { %1022 = vmax.xlane.f32.xlu0 %v1021_v31 }
 0xb23   :  { %v1023_v4 = vpop.xlane.xlu0 %1022 }
 0xb24   :  { %v1024_v32 = vmax.f32 %v1023_v4, 0.0 }
 0xb26   :  { %v1025_v33 = vsub.f32 %v1881_v29, %v1024_v32  ;;  %v1872_v29 = vld [vmem:[#allocation4 + $0x68] sm:$0xff]  }
 0xb28   :  { %v1026_v34 = vmul.f32 1.442695, %v1025_v33 }
 0xb2a   :  { %1882 = vpow2.f32 %v1026_v34 }
 0xb37   :  { %v1883_v36 = vpop.eup %1882 }
 0xb38   :  { %v1028_v37 = vsel %vm2119_vm5, %v1883_v36, 0.0 }
 0xb39   :  { %v1029_v38 = vsel %vm81_vm2, %v1028_v37, 0.0 }
 0xb3a   :  { %1030 = vadd.xlane.f32.xlu1 %v1029_v38  ;;  %v1563_v38 = vld [vmem:[%s2230_s6 + $0x6] ss:$0 sm:$0xff] }
 0xb4b   :  { %1039 = vrot.lane.b32.xlu1 %v1037_v39, %s1943_s30 }
 0xbc3   :  { %v1031_v40 = vpop.xlane.xlu1 %1030 }
 0xbc4   :  { %vm1032_vm7 = vcmp.gt.f32.partialorder %v1031_v40, 0.0 }
 0xbc5   :  { %v1033_v41 = vsel %vm1032_vm7, %v1031_v40, 1.0 }
 0xbc6   :  { %1884 = vrcp.f32 %v1033_v41 }
 0xbc7   :  { %v1040_v42 = vpop.permute.xlu1 %1039 }
 0xbc8   :  { %v1045_v44 = vsel %vm85_vm1, %v1040_v42, 0 }
 0xbc9   :  { %1778 = vmatpush3.bf16.msra.mxu0 %v1045_v44 }
 0xbca   :  { %1783 = vmatprep.subr.bf16.mxu0 %v1946_v0 }
 0xbd3   :  { %v1885_v45 = vpop.eup %1884 }
 0xbd4   :  { %v1035_v46 = vmul.f32 %v1885_v45, %v1028_v37 }
 0xbd6   :  { %v1036_v48 = vpack.c.bf16 %v1035_v46, %v1035_v46 }
 0xbd8   :  { %1780 = vmatmul.mubr.msk.bf16.vlgmr.msra.gmra.mxu0 %vm81_vm2, %v1036_v48 }
 0xbd9   :  { %1784 = vmatpush3.bf16.msra.mxu0 %v1866_v47  ;;  %1791 = vmatprep.mubr.msk.bf16.mxu0 %vm1947_vm0, %v1946_v0 }
 0xbda   :  { %1785 = vmatprep.subr.bf16.mxu0 %v1946_v0 }
 0xbdd   :  { %1786 = vmatpush3.bf16.msra.mxu0 %v1867_v49 }
 0xbde   :  { %1787 = vmatprep.subr.bf16.mxu0 %v1946_v0 }
 0xbe1   :  { %1788 = vmatpush3.bf16.msra.mxu0 %v1868_v50 }
 0xbe2   :  { %1789 = vmatprep.subr.bf16.mxu0 %v1946_v0 }
 0xbe5   :  { %1790 = vmatpush3.bf16.msra.mxu0 %v1869_v51 }
 0xbe6   :  { %1813 = vmatprep.subr.bf16.mxu0 %v1946_v0 }
 0xc98   :  { %v1081_v52 = vpop.f32.mrf.mxu0 }
 0xc99   :  { %v1087_v53 = vadd.f32 %v1081_v52, %v970_v20 }
 0xc9a   :  { %v1781_v54 = vpop.f32.mrf.mxu0 }
 0xc9b   :  { %v1088_v55 = vmax.f32 %v1087_v53, 0.0 }
 0xc9c   :  { %v1084_v56 = vpop.f32.mrf.mxu0 }
 0xc9d   :  { %1554 = vst.msk [vmem:[%s2232_s8 + $0x8] sm:$0xff] %vm731_vm3, %v1088_v55  ;;  %v1091_v57 = vpack.c.bf16 %v1088_v55, %v1088_v55 }
 0xc9e   :  { %v1782_v58 = vpop.f32.mrf.mxu0 }
 0xc9f   :  { %1792 = vmatmul.mubr.msk.bf16.vlgmr.msra.gmra.mxu0 %vm731_vm3, %v1091_v57 }
 0xca0   :  { %1815 = vmatprep.mubr.msk.bf16.mxu0 %vm1947_vm0, %v1946_v0 }
 0xd5f   :  { %v1168_v60 = vpop.f32.mrf.mxu0 }
 0xd60   :  { %v1169_v62 = vadd.f32 %v1555_v59, %v1168_v60 }
 0xd61   :  { %v1793_v63 = vpop.f32.mrf.mxu0 }
 0xd62   :  { %v1178_v1 = vmul.f32 %v1561_v61, %v1169_v62  ;;  %v1236_v19 = vpack.c.bf16 %v1169_v62, %v1169_v62 }
 0xd63   :  { %v1171_v2 = vpop.f32.mrf.mxu0 }
 0xd64   :  { %1179 = vadd.xlane.f32.xlu1 %v1178_v1 }
 0xd65   :  { %v1794_v3 = vpop.f32.mrf.mxu0 }
 0xded   :  { %v1180_v5 = vpop.xlane.xlu1 %1179 }
 0xdee   :  { %1181 = vxpose.xlu0.b32.start.end [1/1] (short) (narrow) %v1180_v5, 8 }
 0xe6a   :  { %v1197_v6 = vpop.trf.xlu0 }
 0xe6b   :  { %v1216_v7 = vrot.slane %v1197_v6, %v2113_v35 }
 0xe6d   :  { %v1217_v8 = vsub.f32 %v1180_v5, %v1216_v7 }
 0xe6f   :  { %1886 = vtanh.f32 %v1217_v8 }
 0xe7c   :  { %v1887_v9 = vpop.eup %1886 }
 0xe7d   :  { %v1219_v10 = vsel %vm2119_vm5, %v1887_v9, -1e+30 }
 0xe7e   :  { %v1220_v11 = vsel %vm81_vm2, %v1219_v10, -inf }
 0xe7f   :  { %1221 = vmax.xlane.f32.xlu1 %v1220_v11 }
 0xf08   :  { %v1222_v12 = vpop.xlane.xlu1 %1221 }
 0xf09   :  { %v1223_v13 = vmax.f32 %v1222_v12, 0.0 }
 0xf0b   :  { %v1224_v14 = vsub.f32 %v1887_v9, %v1223_v13 }
 0xf0d   :  { %v1225_v15 = vmul.f32 1.442695, %v1224_v14 }
 0xf0f   :  { %1888 = vpow2.f32 %v1225_v15 }
 0xf1c   :  { %v1889_v16 = vpop.eup %1888 }
 0xf1d   :  { %v1227_v17 = vsel %vm2119_vm5, %v1889_v16, 0.0 }
 0xf1e   :  { %v1228_v18 = vsel %vm81_vm2, %v1227_v17, 0.0 }
 0xf1f   :  { %1229 = vadd.xlane.f32.xlu1 %v1228_v18 }
 0xf30   :  { %1238 = vrot.lane.b32.xlu1 %v1236_v19, %s1943_s30 }
 0xfa8   :  { %v1230_v20 = vpop.xlane.xlu1 %1229 }
 0xfa9   :  { %vm1231_vm8 = vcmp.gt.f32.partialorder %v1230_v20, 0.0 }
 0xfaa   :  { %v1232_v21 = vsel %vm1231_vm8, %v1230_v20, 1.0 }
 0xfab   :  { %1890 = vrcp.f32 %v1232_v21 }
 0xfac   :  { %v1239_v22 = vpop.permute.xlu1 %1238 }
 0xfad   :  { %v1244_v23 = vsel %vm85_vm1, %v1239_v22, 0 }
 0xfae   :  { %1796 = vmatpush3.bf16.msra.mxu1 %v1244_v23 }
 0xfaf   :  { %1801 = vmatprep.subr.bf16.mxu1 %v1946_v0 }
 0xfb8   :  { %v1891_v24 = vpop.eup %1890 }
 0xfb9   :  { %v1234_v25 = vmul.f32 %v1891_v24, %v1227_v17 }
 0xfbb   :  { %v1235_v27 = vpack.c.bf16 %v1234_v25, %v1234_v25 }
 0xfbd   :  { %1798 = vmatmul.mubr.msk.bf16.vlgmr.msra.gmra.mxu1 %vm81_vm2, %v1235_v27 }
 0xfbe   :  { %1802 = vmatpush3.bf16.msra.mxu1 %v1870_v26  ;;  %1809 = vmatprep.mubr.msk.bf16.mxu1 %vm1947_vm0, %v1946_v0 }
 0xfbf   :  { %1803 = vmatprep.subr.bf16.mxu1 %v1946_v0 }
 0xfc2   :  { %1804 = vmatpush3.bf16.msra.mxu1 %v1871_v28 }
 0xfc3   :  { %1805 = vmatprep.subr.bf16.mxu1 %v1946_v0 }
 0xfc6   :  { %1806 = vmatpush3.bf16.msra.mxu1 %v1872_v29 }
 0xfc7   :  { %1807 = vmatprep.subr.bf16.mxu1 %v1946_v0  ;;  %v1569_v0 = vld [vmem:[%s2230_s6 + $0x7] ss:$0 sm:$0xff] }
 0xfca   :  { %1808 = vmatpush3.bf16.msra.mxu1 %v1873_v30 }
0x107d   :  { %v1280_v31 = vpop.f32.mrf.mxu1 }
0x107e   :  { %v1286_v4 = vadd.f32 %v1280_v31, %v1169_v62 }
0x107f   :  { %v1799_v32 = vpop.f32.mrf.mxu1 }
0x1080   :  { %v1287_v33 = vmax.f32 %v1286_v4, 0.0 }
0x1081   :  { %v1283_v34 = vpop.f32.mrf.mxu1 }
0x1082   :  { %v1288_v36 = vpack.c.bf16 %v1287_v33, %v1287_v33 }
0x1083   :  { %v1800_v37 = vpop.f32.mrf.mxu1 }
0x1084   :  { %1810 = vmatmul.mubr.msk.bf16.vlgmr.msra.gmra.mxu1 %vm731_vm3, %v1288_v36 }
0x1144   :  { %v1365_v39 = vpop.f32.mrf.mxu1 }
0x1145   :  { %v1366_v40 = vadd.f32 %v1563_v38, %v1365_v39 }
0x1146   :  { %v1811_v41 = vpop.f32.mrf.mxu1 }
0x1147   :  { %v1375_v42 = vmul.f32 %v1569_v0, %v1366_v40  ;;  %v1433_v59 = vpack.c.bf16 %v1366_v40, %v1366_v40 }
0x1148   :  { %v1368_v44 = vpop.f32.mrf.mxu1 }
0x1149   :  { %1376 = vadd.xlane.f32.xlu0 %v1375_v42 }
0x114a   :  { %v1812_v45 = vpop.f32.mrf.mxu1 }
0x11d2   :  { %v1377_v46 = vpop.xlane.xlu0 %1376 }
0x11d3   :  { %1378 = vxpose.xlu1.b32.start.end [1/1] (short) (narrow) %v1377_v46, 8 }
0x124f   :  { %v1394_v47 = vpop.trf.xlu1 }
0x1250   :  { %v1413_v48 = vrot.slane %v1394_v47, %v2113_v35 }
0x1252   :  { %v1414_v49 = vsub.f32 %v1377_v46, %v1413_v48 }
0x1254   :  { %1892 = vtanh.f32 %v1414_v49 }
0x1261   :  { %v1893_v50 = vpop.eup %1892 }
0x1262   :  { %v1416_v51 = vsel %vm2119_vm5, %v1893_v50, -1e+30 }
0x1263   :  { %v1417_v52 = vsel %vm81_vm2, %v1416_v51, -inf }
0x1264   :  { %1418 = vmax.xlane.f32.xlu1 %v1417_v52 }
0x12ed   :  { %v1419_v53 = vpop.xlane.xlu1 %1418 }
0x12ee   :  { %v1420_v54 = vmax.f32 %v1419_v53, 0.0 }
0x12f0   :  { %v1421_v55 = vsub.f32 %v1893_v50, %v1420_v54 }
0x12f2   :  { %v1422_v56 = vmul.f32 1.442695, %v1421_v55 }
0x12f4   :  { %1894 = vpow2.f32 %v1422_v56 }
0x1301   :  { %v1895_v57 = vpop.eup %1894 }
0x1302   :  { %v1424_v58 = vsel %vm2119_vm5, %v1895_v57, 0.0 }
0x1303   :  { %v1425_v35 = vsel %vm81_vm2, %v1424_v58, 0.0 }
0x1304   :  { %1426 = vadd.xlane.f32.xlu0 %v1425_v35 }
0x131a   :  { %1435 = vrot.lane.b32.xlu0 %v1433_v59, %s1943_s30 }
0x138d   :  { %v1427_v60 = vpop.xlane.xlu0 %1426 }
0x138e   :  { %vm1428_vm9 = vcmp.gt.f32.partialorder %v1427_v60, 0.0 }
0x138f   :  { %v1429_v61 = vsel %vm1428_vm9, %v1427_v60, 1.0 }
0x1390   :  { %1896 = vrcp.f32 %v1429_v61 }
0x1391   :  { %v1436_v62 = vpop.permute.xlu0 %1435 }
0x1392   :  { %v1441_v63 = vsel %vm85_vm1, %v1436_v62, 0 }
0x1393   :  { %1814 = vmatpush3.bf16.msra.mxu0 %v1441_v63 }
0x139d   :  { %v1897_v1 = vpop.eup %1896 }
0x139e   :  { %v1431_v2 = vmul.f32 %v1897_v1, %v1424_v58 }
0x13a0   :  { %v1432_v3 = vpack.c.bf16 %v1431_v2, %v1431_v2 }
0x13a2   :  { %1816 = vmatmul.mubr.msk.bf16.vlgmr.msra.gmra.mxu0 %vm81_vm2, %v1432_v3 }
0x1462   :  { %v1477_v43 = vpop.f32.mrf.mxu0 }
0x1463   :  { %v1483_v5 = vadd.f32 %v1477_v43, %v1366_v40 }
0x1464   :  { %v1817_v6 = vpop.f32.mrf.mxu0 }
0x1465   :  { %v1484_v7 = vmax.f32 %v1483_v5, 0.0 }
0x1466   :  { %v1480_v8 = vpop.f32.mrf.mxu0 }
0x1467   :  { %1485 = vst.msk [vmem:[%s2232_s8] sm:$0xff] %vm731_vm3, %v1484_v7 }
0x1468   :  { %v1818_v9 = vpop.f32.mrf.mxu0 }
0x1469   :  { %1494 = vsyncpa [#allocation3], 1 }
0x146a   :  { %1495 = vsyncpa [#allocation5], 1 }

</bundles_post_ra>
